<compile_context>
chip_gen: v7x
topology: tpu7x:2x2x1
jax: 0.10.0
libtpu: 0.0.40
codegen_flags: <defaults>
</compile_context>

<pallas_src>
import math
import functools

import jax
import jax.numpy as jnp
from jax import lax
from jax.experimental import pallas as pl
from jax.experimental.pallas import tpu as pltpu


def _layernorm(z, g, b, eps):
    mean = jnp.mean(z, axis=-1, keepdims=True)
    var = jnp.mean((z - mean) ** 2, axis=-1, keepdims=True)
    return (z - mean) * lax.rsqrt(var + eps) * g + b


# ----------------------------------------------------------------------------
# Kernel 1: fused EncoderLayer
#   (QKV -> MHA -> out-proj -> +res -> LN1 -> FFN -> +res -> LN2 [-> final LN])
# ----------------------------------------------------------------------------
def _encoder_layer_kernel(x_ref, wqkv_ref, bqkv_ref, wo_ref, bo_ref,
                          ln1g_ref, ln1b_ref, w1_ref, b1_ref, w2_ref, b2_ref,
                          ln2g_ref, ln2b_ref, lnfg_ref, lnfb_ref, o_ref,
                          *, n_heads, eps, apply_final_norm):
    x = x_ref[0].astype(jnp.float32)                      # (L, D)
    L, D = x.shape
    E = D // n_heads
    scale = 1.0 / math.sqrt(E)

    # ---- multi-head self-attention -----------------------------------------
    # fused QKV projection: one MXU pass over x
    qkv = jnp.dot(x, wqkv_ref[...].astype(jnp.float32),
                  preferred_element_type=jnp.float32) + bqkv_ref[...]   # (L, 3D)

    wo = wo_ref[...].astype(jnp.float32)                  # (D, D)
    y = jnp.broadcast_to(bo_ref[...].astype(jnp.float32), (L, D))       # out-proj acc
    for h in range(n_heads):
        q = qkv[:, h * E:(h + 1) * E]
        k = qkv[:, D + h * E:D + (h + 1) * E]
        v = qkv[:, 2 * D + h * E:2 * D + (h + 1) * E]
        # contract last dims directly: no explicit k transpose / XLU relayout
        s = lax.dot_general(q, k, (((1,), (1,)), ((), ())),
                            preferred_element_type=jnp.float32) * scale
        s = s - jnp.max(s, axis=-1, keepdims=True)
        p = jnp.exp(s)
        p = p * pl.reciprocal(jnp.sum(p, axis=-1, keepdims=True), approx=True)
        o_h = jnp.dot(p, v, preferred_element_type=jnp.float32)         # (L, E)
        # fold the out-projection per head (avoids a lane concat of heads)
        y = y + jnp.dot(o_h, wo[h * E:(h + 1) * E, :],
                        preferred_element_type=jnp.float32)

    z = _layernorm(x + y, ln1g_ref[...], ln1b_ref[...], eps)            # res + LN1

    # ---- position-wise FFN (intermediate (L, d_ff) stays on-chip) ----------
    ff = jnp.dot(z, w1_ref[...].astype(jnp.float32),
                 preferred_element_type=jnp.float32) + b1_ref[...]
    ff = jnp.maximum(ff, 0.0)                             # ReLU
    y2 = jnp.dot(ff, w2_ref[...].astype(jnp.float32),
                 preferred_element_type=jnp.float32) + b2_ref[...]
    z2 = _layernorm(z + y2, ln2g_ref[...], ln2b_ref[...], eps)          # res + LN2

    if apply_final_norm:                                  # encoder's final LN, fused
        z2 = _layernorm(z2, lnfg_ref[...], lnfb_ref[...], eps)

    o_ref[0] = z2.astype(o_ref.dtype)


def encoder_layer(x, p, n_heads, final_norm=None, eps=1e-5):
    B, L, D = x.shape
    d_ff = p["w1"].shape[1]
    apply_fn = final_norm is not None
    if apply_fn:
        gf, bf = final_norm
    else:
        gf = jnp.ones((D,), jnp.float32)
        bf = jnp.zeros((D,), jnp.float32)

    full = lambda b: (0, 0)
    return pl.pallas_call(
        functools.partial(_encoder_layer_kernel, n_heads=n_heads, eps=eps,
                          apply_final_norm=apply_fn),
        out_shape=jax.ShapeDtypeStruct((B, L, D), x.dtype),
        grid=(B,),
        in_specs=[pl.BlockSpec((1, L, D), lambda b: (b, 0, 0)),
                  pl.BlockSpec((D, 3 * D), full),
                  pl.BlockSpec((1, 3 * D), full),
                  pl.BlockSpec((D, D), full),
                  pl.BlockSpec((1, D), full),
                  pl.BlockSpec((1, D), full),
                  pl.BlockSpec((1, D), full),
                  pl.BlockSpec((D, d_ff), full),
                  pl.BlockSpec((1, d_ff), full),
                  pl.BlockSpec((d_ff, D), full),
                  pl.BlockSpec((1, D), full),
                  pl.BlockSpec((1, D), full),
                  pl.BlockSpec((1, D), full),
                  pl.BlockSpec((1, D), full),
                  pl.BlockSpec((1, D), full)],
        out_specs=pl.BlockSpec((1, L, D), lambda b: (b, 0, 0)),
        compiler_params=pltpu.CompilerParams(dimension_semantics=("parallel",)),
    )(x, p["wqkv"], p["bqkv"].reshape(1, 3 * D), p["wo"], p["bo"].reshape(1, D),
      p["ln1_g"].reshape(1, D), p["ln1_b"].reshape(1, D),
      p["w1"], p["b1"].reshape(1, d_ff), p["w2"], p["b2"].reshape(1, D),
      p["ln2_g"].reshape(1, D), p["ln2_b"].reshape(1, D),
      gf.reshape(1, D), bf.reshape(1, D))


# ----------------------------------------------------------------------------
# Kernel 2: ConvLayer = circular Conv1d(k=3) + BatchNorm(eval) + ELU + MaxPool1d(3,2,1)
# ----------------------------------------------------------------------------
def _convlayer_kernel(x_ref, w_ref, b_ref, bn_ref, o_ref, *, L, Lp, eps):
    x = x_ref[0].astype(jnp.float32)                      # (L, D)
    D = x.shape[1]
    Lc = L + 2                                            # conv output length
    # circular pad (2 each side) in VMEM — no extra HBM copy of the padded array
    xp = jnp.concatenate([x[L - 2:, :], x, x[:2, :]], axis=0)           # (L+4, D)

    acc = jnp.dot(xp[0:Lc, :], w_ref[0].astype(jnp.float32),
                  preferred_element_type=jnp.float32)
    acc = acc + jnp.dot(xp[1:1 + Lc, :], w_ref[1].astype(jnp.float32),
                        preferred_element_type=jnp.float32)
    acc = acc + jnp.dot(xp[2:2 + Lc, :], w_ref[2].astype(jnp.float32),
                        preferred_element_type=jnp.float32)
    acc = acc + b_ref[...]

    bn = bn_ref[...].astype(jnp.float32)                  # rows: gamma, beta, mean, var
    y = (acc - bn[2:3, :]) * lax.rsqrt(bn[3:4, :] + eps) * bn[0:1, :] + bn[1:2, :]
    y = jnp.where(y > 0, y, jnp.expm1(jnp.minimum(y, 0.0)))            # ELU(alpha=1)

    # MaxPool1d(kernel=3, stride=2, padding=1), vectorized:
    #   yp = [-big ; y ; (-big pad)]  of length 2*Lp + 1
    #   m[i] = max(yp[i], yp[i+1], yp[i+2])   (2 elementwise maxima over shifted slices)
    #   out[t] = m[2t]                        (stride-2 pick via a 0/1 selection matmul)
    neg = jnp.finfo(jnp.float32).min
    pad_back = 2 * Lp + 1 - (Lc + 1)
    pieces = [jnp.full((1, D), neg, jnp.float32), y]
    if pad_back > 0:
        pieces.append(jnp.full((pad_back, D), neg, jnp.float32))
    yp = jnp.concatenate(pieces, axis=0)                  # (2*Lp + 1, D)
    n_w = 2 * Lp - 1
    m = jnp.maximum(jnp.maximum(yp[0:n_w, :], yp[1:1 + n_w, :]), yp[2:2 + n_w, :])
    rows = lax.broadcasted_iota(jnp.int32, (Lp, n_w), 0)
    cols = lax.broadcasted_iota(jnp.int32, (Lp, n_w), 1)
    sel = (cols == 2 * rows).astype(jnp.float32)          # (Lp, n_w) one-hot rows
    o_ref[0] = jnp.dot(sel, m, preferred_element_type=jnp.float32).astype(o_ref.dtype)


def conv_layer(x, p, eps=1e-5):
    B, L, D = x.shape
    Lc = L + 2
    Lp = (Lc - 1) // 2 + 1
    return pl.pallas_call(
        functools.partial(_convlayer_kernel, L=L, Lp=Lp, eps=eps),
        out_shape=jax.ShapeDtypeStruct((B, Lp, D), x.dtype),
        grid=(B,),
        in_specs=[pl.BlockSpec((1, L, D), lambda b: (b, 0, 0)),
                  pl.BlockSpec((3, D, D), lambda b: (0, 0, 0)),
                  pl.BlockSpec((1, D), lambda b: (0, 0)),
                  pl.BlockSpec((4, D), lambda b: (0, 0))],
        out_specs=pl.BlockSpec((1, Lp, D), lambda b: (b, 0, 0)),
        compiler_params=pltpu.CompilerParams(dimension_semantics=("parallel",)),
    )(x, p["w_taps"], p["b"].reshape(1, D), p["bn"])


# ----------------------------------------------------------------------------
# Module glue
# ----------------------------------------------------------------------------
def encoder_forward(x, params, n_heads, attn_mask=None):
    attn_layers = params["attn_layers"]
    conv_layers = params["conv_layers"]
    norm = params["norm"]                                 # (gamma, beta) or None
    n_layers = len(attn_layers)
    if conv_layers is not None:
        for ap, cp in zip(attn_layers, conv_layers):
            x = encoder_layer(x, ap, n_heads)             # attn+LN1+FFN+LN2 (1 kernel)
            x = conv_layer(x, cp)
        x = encoder_layer(x, attn_layers[-1], n_heads, final_norm=norm)
    else:
        for i, ap in enumerate(attn_layers):
            fn = norm if i == n_layers - 1 else None
            x = encoder_layer(x, ap, n_heads, final_norm=fn)
    return x


# ----------------------------------------------------------------------------
# Deterministic parameter construction
# ----------------------------------------------------------------------------
def _rand(key, shape, scale=0.05):
    return jax.random.normal(key, shape, jnp.float32) * scale


def init_encoder_layer_params(key, d_model, d_ff):
    ks = jax.random.split(key, 8)
    return dict(
        wqkv=_rand(ks[0], (d_model, 3 * d_model)),        # fused Q|K|V projection
        bqkv=_rand(ks[1], (3 * d_model,), 0.01),
        wo=_rand(ks[2], (d_model, d_model)),
        bo=_rand(ks[3], (d_model,), 0.01),
        w1=_rand(ks[4], (d_model, d_ff)),
        b1=_rand(ks[5], (d_ff,), 0.01),
        w2=_rand(ks[6], (d_ff, d_model)),
        b2=_rand(ks[7], (d_model,), 0.01),
        ln1_g=jnp.ones((d_model,), jnp.float32), ln1_b=jnp.zeros((d_model,), jnp.float32),
        ln2_g=jnp.ones((d_model,), jnp.float32), ln2_b=jnp.zeros((d_model,), jnp.float32),
    )


def init_conv_layer_params(key, d_model):
    kw, kb = jax.random.split(key)
    # PyTorch Conv1d weight is (out_ch, in_ch, 3); store as (3, in, out) taps.
    w = _rand(kw, (d_model, d_model, 3))
    w_taps = jnp.transpose(w, (2, 1, 0))
    b = _rand(kb, (d_model,), 0.01)
    # BatchNorm1d eval-mode: rows = [gamma, beta, running_mean, running_var]
    bn = jnp.stack([jnp.ones((d_model,)), jnp.zeros((d_model,)),
                    jnp.zeros((d_model,)), jnp.ones((d_model,))]).astype(jnp.float32)
    return dict(w_taps=w_taps, b=b, bn=bn)


def init_encoder_params(key, d_model, d_ff, e_layers):
    keys = jax.random.split(key, 2 * e_layers)
    attn_layers = [init_encoder_layer_params(keys[i], d_model, d_ff)
                   for i in range(e_layers)]
    conv_layers = [init_conv_layer_params(keys[e_layers + i], d_model)
                   for i in range(e_layers - 1)]
    norm = (jnp.ones((d_model,), jnp.float32), jnp.zeros((d_model,), jnp.float32))
    return dict(attn_layers=attn_layers, conv_layers=conv_layers, norm=norm)


# ----------------------------------------------------------------------------
if __name__ == "__main__":
    B, L, d_model, n_heads, d_ff, e_layers = 2, 16, 32, 4, 64, 2

    key = jax.random.PRNGKey(0)
    k_x, k_p = jax.random.split(key)
    x = jax.random.normal(k_x, (B, L, d_model), jnp.float32)
    params = init_encoder_params(k_p, d_model, d_ff, e_layers)

    out = jax.block_until_ready(encoder_forward(x, params, n_heads, attn_mask=None))

    # sanity: conv distillation halves the sequence (L=16 -> 9), d_model preserved
    Lp = ((L + 2) - 1) // 2 + 1
    assert out.shape == (B, Lp, d_model)
    assert bool(jnp.all(jnp.isfinite(out)))
    print("KERNEL_OK")
</pallas_src>

<mosaic_0001>
module attributes {stable_mosaic.version = 11 : i64} {
  func.func @_encoder_layer_kernel(%arg0: i32, %arg1: memref<1x16x32xf32, #tpu.memory_space<vmem>>, %arg2: memref<32x96xf32, #tpu.memory_space<vmem>>, %arg3: memref<1x96xf32, #tpu.memory_space<vmem>>, %arg4: memref<32x32xf32, #tpu.memory_space<vmem>>, %arg5: memref<1x32xf32, #tpu.memory_space<vmem>>, %arg6: memref<1x32xf32, #tpu.memory_space<vmem>>, %arg7: memref<1x32xf32, #tpu.memory_space<vmem>>, %arg8: memref<32x64xf32, #tpu.memory_space<vmem>>, %arg9: memref<1x64xf32, #tpu.memory_space<vmem>>, %arg10: memref<64x32xf32, #tpu.memory_space<vmem>>, %arg11: memref<1x32xf32, #tpu.memory_space<vmem>>, %arg12: memref<1x32xf32, #tpu.memory_space<vmem>>, %arg13: memref<1x32xf32, #tpu.memory_space<vmem>>, %arg14: memref<1x32xf32, #tpu.memory_space<vmem>>, %arg15: memref<1x32xf32, #tpu.memory_space<vmem>>, %arg16: memref<1x16x32xf32, #tpu.memory_space<vmem>>) attributes {dimension_semantics = [#tpu.dimension_semantics<parallel>], iteration_bounds = array<i64: 2>, scalar_prefetch = 0 : i64, scratch_operands = 0 : i64, tpu.core_type = #tpu.core_type<tc>, window_params = [{transform_indices = @transform_0, window_bounds = array<i64: 1, 16, 32>}, {pipeline_mode = #tpu.pipeline_mode<synchronous>, transform_indices = @transform_1, window_bounds = array<i64: 32, 96>}, {pipeline_mode = #tpu.pipeline_mode<synchronous>, transform_indices = @transform_2, window_bounds = array<i64: 1, 96>}, {pipeline_mode = #tpu.pipeline_mode<synchronous>, transform_indices = @transform_3, window_bounds = array<i64: 32, 32>}, {pipeline_mode = #tpu.pipeline_mode<synchronous>, transform_indices = @transform_4, window_bounds = array<i64: 1, 32>}, {pipeline_mode = #tpu.pipeline_mode<synchronous>, transform_indices = @transform_5, window_bounds = array<i64: 1, 32>}, {pipeline_mode = #tpu.pipeline_mode<synchronous>, transform_indices = @transform_6, window_bounds = array<i64: 1, 32>}, {pipeline_mode = #tpu.pipeline_mode<synchronous>, transform_indices = @transform_7, window_bounds = array<i64: 32, 64>}, {pipeline_mode = #tpu.pipeline_mode<synchronous>, transform_indices = @transform_8, window_bounds = array<i64: 1, 64>}, {pipeline_mode = #tpu.pipeline_mode<synchronous>, transform_indices = @transform_9, window_bounds = array<i64: 64, 32>}, {pipeline_mode = #tpu.pipeline_mode<synchronous>, transform_indices = @transform_10, window_bounds = array<i64: 1, 32>}, {pipeline_mode = #tpu.pipeline_mode<synchronous>, transform_indices = @transform_11, window_bounds = array<i64: 1, 32>}, {pipeline_mode = #tpu.pipeline_mode<synchronous>, transform_indices = @transform_12, window_bounds = array<i64: 1, 32>}, {pipeline_mode = #tpu.pipeline_mode<synchronous>, transform_indices = @transform_13, window_bounds = array<i64: 1, 32>}, {pipeline_mode = #tpu.pipeline_mode<synchronous>, transform_indices = @transform_14, window_bounds = array<i64: 1, 32>}, {transform_indices = @transform_15, window_bounds = array<i64: 1, 16, 32>}]} {
    %c0 = arith.constant 0 : index
    %c0_0 = arith.constant 0 : index
    %c0_1 = arith.constant 0 : index
    %0 = vector.load %arg1[%c0, %c0_0, %c0_1] : memref<1x16x32xf32, #tpu.memory_space<vmem>>, vector<1x16x32xf32>
    %1 = vector.shape_cast %0 : vector<1x16x32xf32> to vector<16x32xf32>
    %c0_2 = arith.constant 0 : index
    %c0_3 = arith.constant 0 : index
    %2 = vector.load %arg2[%c0_2, %c0_3] : memref<32x96xf32, #tpu.memory_space<vmem>>, vector<32x96xf32>
    %cst = arith.constant dense<0.000000e+00> : vector<16x96xf32>
    %3 = tpu.matmul %1, %2, %cst {dimension_numbers = #tpu.dot_dimension_numbers<[1], [0], [0], [1], [0, 0, 1, 1], [], []>} : vector<16x32xf32>, vector<32x96xf32>, vector<16x96xf32> -> vector<16x96xf32>
    %c0_4 = arith.constant 0 : index
    %c0_5 = arith.constant 0 : index
    %4 = vector.load %arg3[%c0_4, %c0_5] : memref<1x96xf32, #tpu.memory_space<vmem>>, vector<1x96xf32>
    %5 = vector.broadcast %4 : vector<1x96xf32> to vector<16x96xf32>
    %6 = arith.addf %3, %5 : vector<16x96xf32>
    %c0_6 = arith.constant 0 : index
    %c0_7 = arith.constant 0 : index
    %7 = vector.load %arg4[%c0_6, %c0_7] : memref<32x32xf32, #tpu.memory_space<vmem>>, vector<32x32xf32>
    %c0_8 = arith.constant 0 : index
    %c0_9 = arith.constant 0 : index
    %8 = vector.load %arg5[%c0_8, %c0_9] : memref<1x32xf32, #tpu.memory_space<vmem>>, vector<1x32xf32>
    %9 = vector.shape_cast %8 : vector<1x32xf32> to vector<1x32xf32>
    %10 = vector.broadcast %9 : vector<1x32xf32> to vector<16x32xf32>
    %11 = vector.extract_strided_slice %6 {offsets = [0, 0], sizes = [16, 8], strides = [1, 1]} : vector<16x96xf32> to vector<16x8xf32>
    %12 = vector.extract_strided_slice %6 {offsets = [0, 32], sizes = [16, 8], strides = [1, 1]} : vector<16x96xf32> to vector<16x8xf32>
    %13 = vector.extract_strided_slice %6 {offsets = [0, 64], sizes = [16, 8], strides = [1, 1]} : vector<16x96xf32> to vector<16x8xf32>
    %cst_10 = arith.constant dense<0.000000e+00> : vector<16x16xf32>
    %14 = tpu.matmul %11, %12, %cst_10 {dimension_numbers = #tpu.dot_dimension_numbers<[1], [1], [0], [0], [0, 0, 1, 0], [], []>} : vector<16x8xf32>, vector<16x8xf32>, vector<16x16xf32> -> vector<16x16xf32>
    %cst_11 = arith.constant 0.353553385 : f32
    %15 = vector.broadcast %cst_11 : f32 to vector<16x16xf32>
    %16 = arith.mulf %14, %15 : vector<16x16xf32>
    %cst_12 = arith.constant dense<0xFF800000> : vector<16xf32>
    %17 = vector.multi_reduction <maximumf>, %16, %cst_12 [1] : vector<16x16xf32> to vector<16xf32>
    %18 = vector.shape_cast %17 : vector<16xf32> to vector<16x1xf32>
    %19 = vector.broadcast %18 : vector<16x1xf32> to vector<16x16xf32>
    %20 = arith.subf %16, %19 : vector<16x16xf32>
    %21 = math.exp %20 : vector<16x16xf32>
    %cst_13 = arith.constant dense<0.000000e+00> : vector<16xf32>
    %22 = vector.multi_reduction <add>, %21, %cst_13 [1] : vector<16x16xf32> to vector<16xf32>
    %23 = vector.shape_cast %22 : vector<16xf32> to vector<16x1xf32>
    %24 = tpu.reciprocal %23 {approx = true} : vector<16x1xf32> -> vector<16x1xf32>
    %25 = vector.broadcast %24 : vector<16x1xf32> to vector<16x16xf32>
    %26 = arith.mulf %21, %25 : vector<16x16xf32>
    %cst_14 = arith.constant dense<0.000000e+00> : vector<16x8xf32>
    %27 = tpu.matmul %26, %13, %cst_14 {dimension_numbers = #tpu.dot_dimension_numbers<[1], [0], [0], [1], [0, 0, 1, 1], [], []>} : vector<16x16xf32>, vector<16x8xf32>, vector<16x8xf32> -> vector<16x8xf32>
    %28 = vector.extract_strided_slice %7 {offsets = [0, 0], sizes = [8, 32], strides = [1, 1]} : vector<32x32xf32> to vector<8x32xf32>
    %cst_15 = arith.constant dense<0.000000e+00> : vector<16x32xf32>
    %29 = tpu.matmul %27, %28, %cst_15 {dimension_numbers = #tpu.dot_dimension_numbers<[1], [0], [0], [1], [0, 0, 1, 1], [], []>} : vector<16x8xf32>, vector<8x32xf32>, vector<16x32xf32> -> vector<16x32xf32>
    %30 = arith.addf %10, %29 : vector<16x32xf32>
    %31 = vector.extract_strided_slice %6 {offsets = [0, 8], sizes = [16, 8], strides = [1, 1]} : vector<16x96xf32> to vector<16x8xf32>
    %32 = vector.extract_strided_slice %6 {offsets = [0, 40], sizes = [16, 8], strides = [1, 1]} : vector<16x96xf32> to vector<16x8xf32>
    %33 = vector.extract_strided_slice %6 {offsets = [0, 72], sizes = [16, 8], strides = [1, 1]} : vector<16x96xf32> to vector<16x8xf32>
    %cst_16 = arith.constant dense<0.000000e+00> : vector<16x16xf32>
    %34 = tpu.matmul %31, %32, %cst_16 {dimension_numbers = #tpu.dot_dimension_numbers<[1], [1], [0], [0], [0, 0, 1, 0], [], []>} : vector<16x8xf32>, vector<16x8xf32>, vector<16x16xf32> -> vector<16x16xf32>
    %cst_17 = arith.constant 0.353553385 : f32
    %35 = vector.broadcast %cst_17 : f32 to vector<16x16xf32>
    %36 = arith.mulf %34, %35 : vector<16x16xf32>
    %cst_18 = arith.constant dense<0xFF800000> : vector<16xf32>
    %37 = vector.multi_reduction <maximumf>, %36, %cst_18 [1] : vector<16x16xf32> to vector<16xf32>
    %38 = vector.shape_cast %37 : vector<16xf32> to vector<16x1xf32>
    %39 = vector.broadcast %38 : vector<16x1xf32> to vector<16x16xf32>
    %40 = arith.subf %36, %39 : vector<16x16xf32>
    %41 = math.exp %40 : vector<16x16xf32>
    %cst_19 = arith.constant dense<0.000000e+00> : vector<16xf32>
    %42 = vector.multi_reduction <add>, %41, %cst_19 [1] : vector<16x16xf32> to vector<16xf32>
    %43 = vector.shape_cast %42 : vector<16xf32> to vector<16x1xf32>
    %44 = tpu.reciprocal %43 {approx = true} : vector<16x1xf32> -> vector<16x1xf32>
    %45 = vector.broadcast %44 : vector<16x1xf32> to vector<16x16xf32>
    %46 = arith.mulf %41, %45 : vector<16x16xf32>
    %cst_20 = arith.constant dense<0.000000e+00> : vector<16x8xf32>
    %47 = tpu.matmul %46, %33, %cst_20 {dimension_numbers = #tpu.dot_dimension_numbers<[1], [0], [0], [1], [0, 0, 1, 1], [], []>} : vector<16x16xf32>, vector<16x8xf32>, vector<16x8xf32> -> vector<16x8xf32>
    %48 = vector.extract_strided_slice %7 {offsets = [8, 0], sizes = [8, 32], strides = [1, 1]} : vector<32x32xf32> to vector<8x32xf32>
    %cst_21 = arith.constant dense<0.000000e+00> : vector<16x32xf32>
    %49 = tpu.matmul %47, %48, %cst_21 {dimension_numbers = #tpu.dot_dimension_numbers<[1], [0], [0], [1], [0, 0, 1, 1], [], []>} : vector<16x8xf32>, vector<8x32xf32>, vector<16x32xf32> -> vector<16x32xf32>
    %50 = arith.addf %30, %49 : vector<16x32xf32>
    %51 = vector.extract_strided_slice %6 {offsets = [0, 16], sizes = [16, 8], strides = [1, 1]} : vector<16x96xf32> to vector<16x8xf32>
    %52 = vector.extract_strided_slice %6 {offsets = [0, 48], sizes = [16, 8], strides = [1, 1]} : vector<16x96xf32> to vector<16x8xf32>
    %53 = vector.extract_strided_slice %6 {offsets = [0, 80], sizes = [16, 8], strides = [1, 1]} : vector<16x96xf32> to vector<16x8xf32>
    %cst_22 = arith.constant dense<0.000000e+00> : vector<16x16xf32>
    %54 = tpu.matmul %51, %52, %cst_22 {dimension_numbers = #tpu.dot_dimension_numbers<[1], [1], [0], [0], [0, 0, 1, 0], [], []>} : vector<16x8xf32>, vector<16x8xf32>, vector<16x16xf32> -> vector<16x16xf32>
    %cst_23 = arith.constant 0.353553385 : f32
    %55 = vector.broadcast %cst_23 : f32 to vector<16x16xf32>
    %56 = arith.mulf %54, %55 : vector<16x16xf32>
    %cst_24 = arith.constant dense<0xFF800000> : vector<16xf32>
    %57 = vector.multi_reduction <maximumf>, %56, %cst_24 [1] : vector<16x16xf32> to vector<16xf32>
    %58 = vector.shape_cast %57 : vector<16xf32> to vector<16x1xf32>
    %59 = vector.broadcast %58 : vector<16x1xf32> to vector<16x16xf32>
    %60 = arith.subf %56, %59 : vector<16x16xf32>
    %61 = math.exp %60 : vector<16x16xf32>
    %cst_25 = arith.constant dense<0.000000e+00> : vector<16xf32>
    %62 = vector.multi_reduction <add>, %61, %cst_25 [1] : vector<16x16xf32> to vector<16xf32>
    %63 = vector.shape_cast %62 : vector<16xf32> to vector<16x1xf32>
    %64 = tpu.reciprocal %63 {approx = true} : vector<16x1xf32> -> vector<16x1xf32>
    %65 = vector.broadcast %64 : vector<16x1xf32> to vector<16x16xf32>
    %66 = arith.mulf %61, %65 : vector<16x16xf32>
    %cst_26 = arith.constant dense<0.000000e+00> : vector<16x8xf32>
    %67 = tpu.matmul %66, %53, %cst_26 {dimension_numbers = #tpu.dot_dimension_numbers<[1], [0], [0], [1], [0, 0, 1, 1], [], []>} : vector<16x16xf32>, vector<16x8xf32>, vector<16x8xf32> -> vector<16x8xf32>
    %68 = vector.extract_strided_slice %7 {offsets = [16, 0], sizes = [8, 32], strides = [1, 1]} : vector<32x32xf32> to vector<8x32xf32>
    %cst_27 = arith.constant dense<0.000000e+00> : vector<16x32xf32>
    %69 = tpu.matmul %67, %68, %cst_27 {dimension_numbers = #tpu.dot_dimension_numbers<[1], [0], [0], [1], [0, 0, 1, 1], [], []>} : vector<16x8xf32>, vector<8x32xf32>, vector<16x32xf32> -> vector<16x32xf32>
    %70 = arith.addf %50, %69 : vector<16x32xf32>
    %71 = vector.extract_strided_slice %6 {offsets = [0, 24], sizes = [16, 8], strides = [1, 1]} : vector<16x96xf32> to vector<16x8xf32>
    %72 = vector.extract_strided_slice %6 {offsets = [0, 56], sizes = [16, 8], strides = [1, 1]} : vector<16x96xf32> to vector<16x8xf32>
    %73 = vector.extract_strided_slice %6 {offsets = [0, 88], sizes = [16, 8], strides = [1, 1]} : vector<16x96xf32> to vector<16x8xf32>
    %cst_28 = arith.constant dense<0.000000e+00> : vector<16x16xf32>
    %74 = tpu.matmul %71, %72, %cst_28 {dimension_numbers = #tpu.dot_dimension_numbers<[1], [1], [0], [0], [0, 0, 1, 0], [], []>} : vector<16x8xf32>, vector<16x8xf32>, vector<16x16xf32> -> vector<16x16xf32>
    %cst_29 = arith.constant 0.353553385 : f32
    %75 = vector.broadcast %cst_29 : f32 to vector<16x16xf32>
    %76 = arith.mulf %74, %75 : vector<16x16xf32>
    %cst_30 = arith.constant dense<0xFF800000> : vector<16xf32>
    %77 = vector.multi_reduction <maximumf>, %76, %cst_30 [1] : vector<16x16xf32> to vector<16xf32>
    %78 = vector.shape_cast %77 : vector<16xf32> to vector<16x1xf32>
    %79 = vector.broadcast %78 : vector<16x1xf32> to vector<16x16xf32>
    %80 = arith.subf %76, %79 : vector<16x16xf32>
    %81 = math.exp %80 : vector<16x16xf32>
    %cst_31 = arith.constant dense<0.000000e+00> : vector<16xf32>
    %82 = vector.multi_reduction <add>, %81, %cst_31 [1] : vector<16x16xf32> to vector<16xf32>
    %83 = vector.shape_cast %82 : vector<16xf32> to vector<16x1xf32>
    %84 = tpu.reciprocal %83 {approx = true} : vector<16x1xf32> -> vector<16x1xf32>
    %85 = vector.broadcast %84 : vector<16x1xf32> to vector<16x16xf32>
    %86 = arith.mulf %81, %85 : vector<16x16xf32>
    %cst_32 = arith.constant dense<0.000000e+00> : vector<16x8xf32>
    %87 = tpu.matmul %86, %73, %cst_32 {dimension_numbers = #tpu.dot_dimension_numbers<[1], [0], [0], [1], [0, 0, 1, 1], [], []>} : vector<16x16xf32>, vector<16x8xf32>, vector<16x8xf32> -> vector<16x8xf32>
    %88 = vector.extract_strided_slice %7 {offsets = [24, 0], sizes = [8, 32], strides = [1, 1]} : vector<32x32xf32> to vector<8x32xf32>
    %cst_33 = arith.constant dense<0.000000e+00> : vector<16x32xf32>
    %89 = tpu.matmul %87, %88, %cst_33 {dimension_numbers = #tpu.dot_dimension_numbers<[1], [0], [0], [1], [0, 0, 1, 1], [], []>} : vector<16x8xf32>, vector<8x32xf32>, vector<16x32xf32> -> vector<16x32xf32>
    %90 = arith.addf %70, %89 : vector<16x32xf32>
    %91 = arith.addf %1, %90 : vector<16x32xf32>
    %c0_34 = arith.constant 0 : index
    %c0_35 = arith.constant 0 : index
    %92 = vector.load %arg6[%c0_34, %c0_35] : memref<1x32xf32, #tpu.memory_space<vmem>>, vector<1x32xf32>
    %c0_36 = arith.constant 0 : index
    %c0_37 = arith.constant 0 : index
    %93 = vector.load %arg7[%c0_36, %c0_37] : memref<1x32xf32, #tpu.memory_space<vmem>>, vector<1x32xf32>
    %cst_38 = arith.constant dense<0.000000e+00> : vector<16xf32>
    %94 = vector.multi_reduction <add>, %91, %cst_38 [1] : vector<16x32xf32> to vector<16xf32>
    %95 = vector.shape_cast %94 : vector<16xf32> to vector<16x1xf32>
    %cst_39 = arith.constant 3.200000e+01 : f32
    %96 = vector.broadcast %cst_39 : f32 to vector<16x1xf32>
    %97 = arith.divf %95, %96 : vector<16x1xf32>
    %98 = vector.broadcast %97 : vector<16x1xf32> to vector<16x32xf32>
    %99 = arith.subf %91, %98 : vector<16x32xf32>
    %100 = arith.mulf %99, %99 : vector<16x32xf32>
    %cst_40 = arith.constant dense<0.000000e+00> : vector<16xf32>
    %101 = vector.multi_reduction <add>, %100, %cst_40 [1] : vector<16x32xf32> to vector<16xf32>
    %102 = vector.shape_cast %101 : vector<16xf32> to vector<16x1xf32>
    %cst_41 = arith.constant 3.200000e+01 : f32
    %103 = vector.broadcast %cst_41 : f32 to vector<16x1xf32>
    %104 = arith.divf %102, %103 : vector<16x1xf32>
    %105 = vector.broadcast %97 : vector<16x1xf32> to vector<16x32xf32>
    %106 = arith.subf %91, %105 : vector<16x32xf32>
    %cst_42 = arith.constant 9.99999974E-6 : f32
    %107 = vector.broadcast %cst_42 : f32 to vector<16x1xf32>
    %108 = arith.addf %104, %107 : vector<16x1xf32>
    %109 = math.rsqrt %108 : vector<16x1xf32>
    %110 = vector.broadcast %109 : vector<16x1xf32> to vector<16x32xf32>
    %111 = arith.mulf %106, %110 : vector<16x32xf32>
    %112 = vector.broadcast %92 : vector<1x32xf32> to vector<16x32xf32>
    %113 = arith.mulf %111, %112 : vector<16x32xf32>
    %114 = vector.broadcast %93 : vector<1x32xf32> to vector<16x32xf32>
    %115 = arith.addf %113, %114 : vector<16x32xf32>
    %c0_43 = arith.constant 0 : index
    %c0_44 = arith.constant 0 : index
    %116 = vector.load %arg8[%c0_43, %c0_44] : memref<32x64xf32, #tpu.memory_space<vmem>>, vector<32x64xf32>
    %cst_45 = arith.constant dense<0.000000e+00> : vector<16x64xf32>
    %117 = tpu.matmul %115, %116, %cst_45 {dimension_numbers = #tpu.dot_dimension_numbers<[1], [0], [0], [1], [0, 0, 1, 1], [], []>} : vector<16x32xf32>, vector<32x64xf32>, vector<16x64xf32> -> vector<16x64xf32>
    %c0_46 = arith.constant 0 : index
    %c0_47 = arith.constant 0 : index
    %118 = vector.load %arg9[%c0_46, %c0_47] : memref<1x64xf32, #tpu.memory_space<vmem>>, vector<1x64xf32>
    %119 = vector.broadcast %118 : vector<1x64xf32> to vector<16x64xf32>
    %120 = arith.addf %117, %119 : vector<16x64xf32>
    %cst_48 = arith.constant 0.000000e+00 : f32
    %121 = vector.broadcast %cst_48 : f32 to vector<16x64xf32>
    %122 = arith.maximumf %120, %121 : vector<16x64xf32>
    %c0_49 = arith.constant 0 : index
    %c0_50 = arith.constant 0 : index
    %123 = vector.load %arg10[%c0_49, %c0_50] : memref<64x32xf32, #tpu.memory_space<vmem>>, vector<64x32xf32>
    %cst_51 = arith.constant dense<0.000000e+00> : vector<16x32xf32>
    %124 = tpu.matmul %122, %123, %cst_51 {dimension_numbers = #tpu.dot_dimension_numbers<[1], [0], [0], [1], [0, 0, 1, 1], [], []>} : vector<16x64xf32>, vector<64x32xf32>, vector<16x32xf32> -> vector<16x32xf32>
    %c0_52 = arith.constant 0 : index
    %c0_53 = arith.constant 0 : index
    %125 = vector.load %arg11[%c0_52, %c0_53] : memref<1x32xf32, #tpu.memory_space<vmem>>, vector<1x32xf32>
    %126 = vector.broadcast %125 : vector<1x32xf32> to vector<16x32xf32>
    %127 = arith.addf %124, %126 : vector<16x32xf32>
    %128 = arith.addf %115, %127 : vector<16x32xf32>
    %c0_54 = arith.constant 0 : index
    %c0_55 = arith.constant 0 : index
    %129 = vector.load %arg12[%c0_54, %c0_55] : memref<1x32xf32, #tpu.memory_space<vmem>>, vector<1x32xf32>
    %c0_56 = arith.constant 0 : index
    %c0_57 = arith.constant 0 : index
    %130 = vector.load %arg13[%c0_56, %c0_57] : memref<1x32xf32, #tpu.memory_space<vmem>>, vector<1x32xf32>
    %cst_58 = arith.constant dense<0.000000e+00> : vector<16xf32>
    %131 = vector.multi_reduction <add>, %128, %cst_58 [1] : vector<16x32xf32> to vector<16xf32>
    %132 = vector.shape_cast %131 : vector<16xf32> to vector<16x1xf32>
    %cst_59 = arith.constant 3.200000e+01 : f32
    %133 = vector.broadcast %cst_59 : f32 to vector<16x1xf32>
    %134 = arith.divf %132, %133 : vector<16x1xf32>
    %135 = vector.broadcast %134 : vector<16x1xf32> to vector<16x32xf32>
    %136 = arith.subf %128, %135 : vector<16x32xf32>
    %137 = arith.mulf %136, %136 : vector<16x32xf32>
    %cst_60 = arith.constant dense<0.000000e+00> : vector<16xf32>
    %138 = vector.multi_reduction <add>, %137, %cst_60 [1] : vector<16x32xf32> to vector<16xf32>
    %139 = vector.shape_cast %138 : vector<16xf32> to vector<16x1xf32>
    %cst_61 = arith.constant 3.200000e+01 : f32
    %140 = vector.broadcast %cst_61 : f32 to vector<16x1xf32>
    %141 = arith.divf %139, %140 : vector<16x1xf32>
    %142 = vector.broadcast %134 : vector<16x1xf32> to vector<16x32xf32>
    %143 = arith.subf %128, %142 : vector<16x32xf32>
    %cst_62 = arith.constant 9.99999974E-6 : f32
    %144 = vector.broadcast %cst_62 : f32 to vector<16x1xf32>
    %145 = arith.addf %141, %144 : vector<16x1xf32>
    %146 = math.rsqrt %145 : vector<16x1xf32>
    %147 = vector.broadcast %146 : vector<16x1xf32> to vector<16x32xf32>
    %148 = arith.mulf %143, %147 : vector<16x32xf32>
    %149 = vector.broadcast %129 : vector<1x32xf32> to vector<16x32xf32>
    %150 = arith.mulf %148, %149 : vector<16x32xf32>
    %151 = vector.broadcast %130 : vector<1x32xf32> to vector<16x32xf32>
    %152 = arith.addf %150, %151 : vector<16x32xf32>
    %c0_63 = arith.constant 0 : index
    %c0_64 = arith.constant 0 : index
    %c0_65 = arith.constant 0 : index
    %153 = vector.load %arg16[%c0_63, %c0_64, %c0_65] : memref<1x16x32xf32, #tpu.memory_space<vmem>>, vector<1x16x32xf32>
    %154 = vector.shape_cast %153 : vector<1x16x32xf32> to vector<16x32xf32>
    %155 = vector.shape_cast %152 : vector<16x32xf32> to vector<1x16x32xf32>
    tpu.vector_store %arg16[%c0_63, %c0_64, %c0_65], %155 {strides = array<i32>} : memref<1x16x32xf32, #tpu.memory_space<vmem>>, vector<1x16x32xf32>,
    return
  }
  func.func @transform_0(%arg0: i32) -> (i32, i32, i32) {
    %c0_i32 = arith.constant 0 : i32
    %c0_i32_0 = arith.constant 0 : i32
    %c0_i32_1 = arith.constant 0 : i32
    return %arg0, %c0_i32, %c0_i32_0 : i32, i32, i32
  }
  func.func @transform_1(%arg0: i32) -> (i32, i32) {
    %c0_i32 = arith.constant 0 : i32
    %c0_i32_0 = arith.constant 0 : i32
    %c0_i32_1 = arith.constant 0 : i32
    return %c0_i32, %c0_i32_0 : i32, i32
  }
  func.func @transform_2(%arg0: i32) -> (i32, i32) {
    %c0_i32 = arith.constant 0 : i32
    %c0_i32_0 = arith.constant 0 : i32
    %c0_i32_1 = arith.constant 0 : i32
    return %c0_i32, %c0_i32_0 : i32, i32
  }
  func.func @transform_3(%arg0: i32) -> (i32, i32) {
    %c0_i32 = arith.constant 0 : i32
    %c0_i32_0 = arith.constant 0 : i32
    %c0_i32_1 = arith.constant 0 : i32
    return %c0_i32, %c0_i32_0 : i32, i32
  }
  func.func @transform_4(%arg0: i32) -> (i32, i32) {
    %c0_i32 = arith.constant 0 : i32
    %c0_i32_0 = arith.constant 0 : i32
    %c0_i32_1 = arith.constant 0 : i32
    return %c0_i32, %c0_i32_0 : i32, i32
  }
  func.func @transform_5(%arg0: i32) -> (i32, i32) {
    %c0_i32 = arith.constant 0 : i32
    %c0_i32_0 = arith.constant 0 : i32
    %c0_i32_1 = arith.constant 0 : i32
    return %c0_i32, %c0_i32_0 : i32, i32
  }
  func.func @transform_6(%arg0: i32) -> (i32, i32) {
    %c0_i32 = arith.constant 0 : i32
    %c0_i32_0 = arith.constant 0 : i32
    %c0_i32_1 = arith.constant 0 : i32
    return %c0_i32, %c0_i32_0 : i32, i32
  }
  func.func @transform_7(%arg0: i32) -> (i32, i32) {
    %c0_i32 = arith.constant 0 : i32
    %c0_i32_0 = arith.constant 0 : i32
    %c0_i32_1 = arith.constant 0 : i32
    return %c0_i32, %c0_i32_0 : i32, i32
  }
  func.func @transform_8(%arg0: i32) -> (i32, i32) {
    %c0_i32 = arith.constant 0 : i32
    %c0_i32_0 = arith.constant 0 : i32
    %c0_i32_1 = arith.constant 0 : i32
    return %c0_i32, %c0_i32_0 : i32, i32
  }
  func.func @transform_9(%arg0: i32) -> (i32, i32) {
    %c0_i32 = arith.constant 0 : i32
    %c0_i32_0 = arith.constant 0 : i32
    %c0_i32_1 = arith.constant 0 : i32
    return %c0_i32, %c0_i32_0 : i32, i32
  }
  func.func @transform_10(%arg0: i32) -> (i32, i32) {
    %c0_i32 = arith.constant 0 : i32
    %c0_i32_0 = arith.constant 0 : i32
    %c0_i32_1 = arith.constant 0 : i32
    return %c0_i32, %c0_i32_0 : i32, i32
  }
  func.func @transform_11(%arg0: i32) -> (i32, i32) {
    %c0_i32 = arith.constant 0 : i32
    %c0_i32_0 = arith.constant 0 : i32
    %c0_i32_1 = arith.constant 0 : i32
    return %c0_i32, %c0_i32_0 : i32, i32
  }
  func.func @transform_12(%arg0: i32) -> (i32, i32) {
    %c0_i32 = arith.constant 0 : i32
    %c0_i32_0 = arith.constant 0 : i32
    %c0_i32_1 = arith.constant 0 : i32
    return %c0_i32, %c0_i32_0 : i32, i32
  }
  func.func @transform_13(%arg0: i32) -> (i32, i32) {
    %c0_i32 = arith.constant 0 : i32
    %c0_i32_0 = arith.constant 0 : i32
    %c0_i32_1 = arith.constant 0 : i32
    return %c0_i32, %c0_i32_0 : i32, i32
  }
  func.func @transform_14(%arg0: i32) -> (i32, i32) {
    %c0_i32 = arith.constant 0 : i32
    %c0_i32_0 = arith.constant 0 : i32
    %c0_i32_1 = arith.constant 0 : i32
    return %c0_i32, %c0_i32_0 : i32, i32
  }
  func.func @transform_15(%arg0: i32) -> (i32, i32, i32) {
    %c0_i32 = arith.constant 0 : i32
    %c0_i32_0 = arith.constant 0 : i32
    %c0_i32_1 = arith.constant 0 : i32
    return %arg0, %c0_i32, %c0_i32_0 : i32, i32, i32
  }
}

</mosaic_0001>

<bundles_post_ra>
// kernel: tpu_custom_call.1
= control target key start
LH: loop header
LB: loop body
LE: loop exit
PB: predicated region body
PF: predicated region fallthrough
CT: control target
= control target key end

     0   :  { %s3389_s0 = inlined_call_operand.vmem [shape: f32[2,16,32], index: 0, kind: input, shape index: {}]   ;;  %s3390_s1 = inlined_call_operand.vmem [shape: f32[32,96], index: 1, kind: input, shape index: {}]   ;;  %s3391_s2 = inlined_call_operand.vmem [shape: f32[1,96], index: 2, kind: input, shape index: {}]   ;;  %s3392_s3 = inlined_call_operand.vmem [shape: f32[32,32], index: 3, kind: input, shape index: {}]   ;;  %s3393_s4 = inlined_call_operand.vmem [shape: f32[1,32], index: 4, kind: input, shape index: {}]   ;;  %s3394_s5 = inlined_call_operand.hbm [shape: f32[1,32], index: 5, kind: input, shape index: {}]   ;;  %s3395_s6 = inlined_call_operand.hbm [shape: f32[1,32], index: 6, kind: input, shape index: {}]   ;;  %s3396_s7 = inlined_call_operand.hbm [shape: f32[32,64], index: 7, kind: input, shape index: {}]   ;;  %s3397_s8 = inlined_call_operand.hbm [shape: f32[1,64], index: 8, kind: input, shape index: {}]   ;;  %s3398_s9 = inlined_call_operand.vmem [shape: f32[64,32], index: 9, kind: input, shape index: {}]   ;;  %s3399_s10 = inlined_call_operand.vmem [shape: f32[1,32], index: 10, kind: input, shape index: {}]   ;;  %s3400_s11 = inlined_call_operand.vmem [shape: f32[1,32], index: 11, kind: input, shape index: {}]   ;;  %s3401_s12 = inlined_call_operand.vmem [shape: f32[1,32], index: 12, kind: input, shape index: {}]   ;;  %s3402_s13 = inlined_call_operand.vmem [shape: f32[1,32], index: 13, kind: input, shape index: {}]   ;;  %s3403_s14 = inlined_call_operand.vmem [shape: f32[1,32], index: 14, kind: input, shape index: {}]   ;;  %s3404_s15 = inlined_call_operand.hbm [shape: f32[2,16,32], index: 15, kind: output, shape index: {}]  }
   0x1   :  { %3415 = sst [smem:[#allocation21_spill]] %s3394_s5 }
   0x2   :  { %3416 = sst [smem:[#allocation22_spill]] %s3395_s6 }
   0x3   :  { %3417 = sst [smem:[#allocation23_spill]] %s3404_s15 }
   0x4   :  { %20 = vsyncpa [#allocation3], 0 }
   0x5   :  { %21 = vsyncpa [#allocation6], 0 }
   0x6   :  { %22 = vsyncpa [#allocation9], 0 }
   0x7   :  { %23 = vsyncpa [#allocation4], 0 }
   0x8   :  { %25 = vsyncpa [#allocation4 + $0x1], 0  ;;  %s2989_s18 = smov 0   ;;  %s2991_s19 = smov 0  }
   0x9   :  { %s2993_s20 = smov 0   ;;  %s2995_s21 = smov 0  }
   0xa LB: > { %3418 = sst [smem:[#allocation15_spill]] %s2875_s18  ;;  %s3010_s13 = sadd.s32 4294967295, %s2887_s21   ;;  %s2887_s21 = sphi %s2995_s21, %s3446_s21   ;;  %s2883_s20 = sphi %s2993_s20, %s3448_s20   ;;  %s2879_s19 = sphi %s2991_s19, %s3450_s19   ;;  %s2875_s18 = sphi %s2989_s18, %s3449_s18  }
   0xb   : > { %3419 = sst [smem:[#allocation16_spill]] %s2883_s20  ;;  %s2195_s14 = sadd.s32 4294967294, %s2887_s21  }
   0xc   : > { %3420 = sst [smem:[#allocation17_spill]] %s2887_s21  ;;  %s3014_s22 = sadd.s32 1, %s2887_s21  }
   0xd   : > { %3421 = sst [smem:[#allocation18_spill]] %s3014_s22  ;;  %s358_s23 = sadd.s32 1, %s2883_s20 }
   0xe   : > { %s355_s24 = ssub.s32 %s2887_s21, %s3014_s22  ;;  %p368_p0 = scmp.ne.s32.totalorder %s2883_s20, %s2879_s19 }
   0xf   : > { %p356_p1 = scmp.eq.s32.totalorder %s355_s24, 0  ;;  %p369_p2 = scmp.eq.s32.totalorder %s3010_s13, 1 }
  0x10   : > { %p374_p3 = scmp.ne.s32.totalorder %s2879_s19, %s2875_s18  ;;  %p375_p4 = scmp.eq.s32.totalorder %s2195_s14, 1 }
  0x11   : > { %s3025_s25 = scalar_select %p356_p1, %s2883_s20, %s358_s23  }
  0x12   : > { %p3027_p5 = por %p369_p2, %p368_p0  ;;  %p3031_p6 = por %p375_p4, %p374_p3 }
  0x13   : > { %3422 = sst [smem:[#allocation19_spill]] %s3025_s25  ;;  %p2196_p7 = scmp.ge.s32.totalorder %s2887_s21, 1 }
  0x14   : > { %s3423_s26 = scalar_select %p3027_p5, 1, 0 }
  0x15   : > { %s3424_s27 = scalar_select %p3031_p6, 1, 0 }
  0x16   : > { %p382_p8 = scmp.lt.s32.totalorder %s2887_s21, 3  ;;  %p3410_p9 = scmp.eq.s32.totalorder %s3010_s13, 0 }
  0x17   : > { %3425 = sst [smem:[#allocation20_spill]] %s3424_s27  ;;  %s2889_s29 = smov [#allocation5]  }
  0x18   : > { %p3038_p10 = pnand %p2196_p7, %p382_p8  ;;  %s418_s30 = sshll.u32 %s2889_s29, 4  ;;  %s419_s30 = int_to_ptr.vmem [resolvable:$true] %s418_s30 }
  0x19   : > { %s2890_s16 = smov [#allocation2]   ;;  %s2891_s23 = smov [#allocation7]  }
  0x1a   : > { %s3426_s28 = scalar_select %p3038_p10, 1, 0 }
  0x1b   : > { %p2544_p11 = pneg %p3038_p10  ;;  %s407_s17 = sshll.u32 %s2890_s16, 4  ;;  %s3050_s17 = int_to_ptr.vmem [resolvable:$true] %s407_s17 }
  0x1c   : > { %s428_s24 = sshll.u32 %s2891_s23, 4  ;;  %s3428_s6 = sld [smem:[#allocation22_spill]]  ;;  %s3052_s24 = int_to_ptr.vmem [resolvable:$true] %s428_s24 }
  0x1d   : > { %p3046_p12 = pnand %p3410_p9, %p2544_p11 }
  0x1f   : > { %p3062_p0 = pneg %p3046_p12 }
  0x22   : > { %s2701_s29 = scalar_lea.hbm %s3428_s6, 16 }
  0x23   : > { %p2702_p13 = scmp.ne.s32.totalorder %s3428_s6, %s2701_s29  ;;  %p2708_p3 = scmp.lt.u32.totalorder %s2701_s29, %s3428_s6 }
  0x25   : > { %p2704_p1 = pnand %p3062_p0, %p2702_p13 }
  0x27   : > { %p2705_p2 = pneg %p2704_p1 }
  0x29   : > { %p2710_p4 = pnand %p2708_p3, %p2705_p2 }
  0x2b   : > { %2713 = shalt.err (!%p2710_p4)
}
  0x2c   : > { %s2714_s20 = scalar_lea.vmem %s419_s30, 16  ;;  %s2721_s22 = scalar_lea.vmem %s419_s30, 32 }
  0x2d   : > { %p2715_p7 = scmp.ne.s32.totalorder %s419_s30, %s2714_s20  ;;  %p2722_p9 = scmp.lt.s32.totalorder %s419_s30, %s419_s30 }
  0x2e   : > { %p2723_p6 = scmp.lt.s32.totalorder %s2721_s22, %s2714_s20 }
  0x2f   : > { %p2717_p8 = pnand %p2715_p7, %p3062_p0 }
  0x30   : > { %p2724_p5 = por %p2723_p6, %p2722_p9 }
  0x31   : > { %p2718_p11 = pneg %p2717_p8 }
  0x33   : > { %p2725_p10 = pnand %p2724_p5, %p2718_p11 }
  0x35   : > { %2728 = shalt.err (!%p2725_p10)
}
  0x36   : > { %2550 = dma.hbm_to_vmem [thread:$0]  (!%p3046_p12), %s3428_s6, 16, %s419_s30, [#allocation6]  }
  0x37   : > { %s3430_s5 = sld [smem:[#allocation21_spill]] }
  0x3d   : > { %s2729_s23 = scalar_lea.hbm %s3430_s5, 16 }
  0x3e   : > { %p2730_p13 = scmp.ne.s32.totalorder %s3430_s5, %s2729_s23  ;;  %p2736_p5 = scmp.lt.u32.totalorder %s2729_s23, %s3430_s5 }
  0x40   : > { %p2732_p1 = pnand %p2730_p13, %p3062_p0 }
  0x42   : > { %p2733_p6 = pneg %p2732_p1 }
  0x44   : > { %p2738_p9 = pnand %p2736_p5, %p2733_p6 }
  0x46   : > { %2741 = shalt.err (!%p2738_p9)
}
  0x47   : > { %s2742_s30 = scalar_lea.vmem %s3050_s17, 16  ;;  %s2749_s15 = scalar_lea.vmem %s3050_s17, 32 }
  0x48   : > { %p2743_p10 = scmp.ne.s32.totalorder %s3050_s17, %s2742_s30  ;;  %p2750_p4 = scmp.lt.s32.totalorder %s3050_s17, %s3050_s17 }
  0x49   : > { %p2751_p7 = scmp.lt.s32.totalorder %s2749_s15, %s2742_s30 }
  0x4a   : > { %p2745_p2 = pnand %p2743_p10, %p3062_p0 }
  0x4b   : > { %p2752_p8 = por %p2751_p7, %p2750_p4 }
  0x4c   : > { %p2746_p3 = pneg %p2745_p2 }
  0x4e   : > { %p2753_p11 = pnand %p2752_p8, %p2746_p3 }
  0x50   : > { %2756 = shalt.err (!%p2753_p11)
}
  0x51   : > { %2547 = dma.hbm_to_vmem [thread:$0]  (!%p3046_p12), %s3430_s5, 16, %s3050_s17, [#allocation3]  }
  0x52   : > { %s2757_s29 = scalar_lea.hbm %s3396_s7, 512 }
  0x53   : > { %p2758_p13 = scmp.ne.s32.totalorder %s3396_s7, %s2757_s29  ;;  %p2764_p5 = scmp.lt.u32.totalorder %s2757_s29, %s3396_s7 }
  0x55   : > { %p2760_p1 = pnand %p2758_p13, %p3062_p0 }
  0x57   : > { %p2761_p6 = pneg %p2760_p1 }
  0x59   : > { %p2766_p9 = pnand %p2764_p5, %p2761_p6 }
  0x5b   : > { %2769 = shalt.err (!%p2766_p9)
}
  0x5c   : > { %s2770_s17 = scalar_lea.vmem %s3052_s24, 512  ;;  %p2778_p4 = scmp.lt.s32.totalorder %s3052_s24, %s3052_s24 }
  0x5d   : > { %p2771_p10 = scmp.ne.s32.totalorder %s3052_s24, %s2770_s17  ;;  %p2779_p7 = scmp.lt.s32.totalorder %s2770_s17, %s2770_s17 }
  0x5f   : > { %p2773_p2 = pnand %p2771_p10, %p3062_p0  ;;  %p2780_p8 = por %p2779_p7, %p2778_p4 }
  0x61   : > { %p2774_p3 = pneg %p2773_p2 }
  0x63   : > { %p2781_p11 = pnand %p2780_p8, %p2774_p3 }
  0x65   : > { %2784 = shalt.err (!%p2781_p11)
}
  0x66   : > { %s2892_s15 = smov 128   ;;  %s2893_s21 = smov 8  }
  0x67   : > { %2553 = dma.hbm_to_vmem [thread:$0]  (!%p3046_p12), %s3396_s7, 512, %s3052_s24, [#allocation6], %s2892_s15, %s2892_s15, %s2893_s21  }
  0x68   : > { %s2894_s18 = smov [#allocation8]   ;;  %s2785_s22 = scalar_lea.hbm %s3397_s8, 16 }
  0x69   : > { %s442_s29 = sshll.u32 %s2894_s18, 4  ;;  %p2786_p13 = scmp.ne.s32.totalorder %s3397_s8, %s2785_s22  ;;  %s443_s29 = int_to_ptr.vmem [resolvable:$true] %s442_s29 }
  0x6a   : > { %p2792_p5 = scmp.lt.u32.totalorder %s2785_s22, %s3397_s8 }
  0x6b   : > { %p2788_p1 = pnand %p2786_p13, %p3062_p0 }
  0x6d   : > { %p2789_p6 = pneg %p2788_p1 }
  0x6f   : > { %p2794_p9 = pnand %p2792_p5, %p2789_p6 }
  0x71   : > { %2797 = shalt.err (!%p2794_p9)
}
  0x72   : > { %s2798_s24 = scalar_lea.vmem %s443_s29, 16  ;;  %s2805_s15 = scalar_lea.vmem %s443_s29, 32 }
  0x73   : > { %p2799_p10 = scmp.ne.s32.totalorder %s443_s29, %s2798_s24  ;;  %p2806_p4 = scmp.lt.s32.totalorder %s443_s29, %s443_s29 }
  0x74   : > { %p2807_p7 = scmp.lt.s32.totalorder %s2805_s15, %s2798_s24 }
  0x75   : > { %p2801_p2 = pnand %p2799_p10, %p3062_p0 }
  0x76   : > { %p2808_p8 = por %p2807_p7, %p2806_p4 }
  0x77   : > { %p2802_p3 = pneg %p2801_p2 }
  0x79   : > { %p2809_p11 = pnand %p2808_p8, %p2802_p3 }
  0x7b   : > { %2812 = shalt.err (!%p2809_p11)
}
  0x7c   : > { %2556 = dma.hbm_to_vmem [thread:$0]  (!%p3046_p12), %s3397_s8, 16, %s443_s29, [#allocation9]  }
  0x7d   : > { %p3431_p13 = scmp.ne.s32.totalorder %s3426_s28, 0 }
  0x7e   : > { %p3432_p1 = scmp.eq.s32.totalorder (!%p3431_p13), %s3010_s13, 0 }
  0x7f   : > { %481 = sbr.rel (%p3431_p13) target bundleno = 3831 (0xef7), region = 80 }
  0x86   : > { %2858 = dma.done.wait (%p3432_p1), [#allocation3], 16   ;;  %p3433_p0 = pmov %p3432_p1 }
  0x88   : > { %2860 = vsyncadd (%p3433_p0), [#allocation3], 4294967280  ;;  %p3434_p6 = pmov %p3433_p0 }
  0x89   : > { %p3435_p5 = pmov %p3433_p0 }
  0x8a   : > { %2862 = dma.done.wait (%p3434_p6), [#allocation6], 528  }
  0x8b   : > { %2864 = vsyncadd (%p3435_p5), [#allocation6], 4294966768  ;;  %p3436_p9 = pmov %p3433_p0 }
  0x8c   : > { %p3437_p12 = pmov %p3433_p0 }
  0x8d   : > { %2866 = dma.done.wait (%p3436_p9), [#allocation9], 16  }
  0x8e   : > { %2868 = vsyncadd (%p3437_p12), [#allocation9], 4294967280  ;;  %p541_p10 = scmp.lt.s32.totalorder %s3010_s13, 1  ;;  %vm559_vm0 = vcmask 261120   ;;  %v548_v0 = vld [vmem:[%s3390_s1] sm:$0xff]  ;;  %v549_v1 = vld [vmem:[%s3390_s1 + $0x8] sm:$0xff] }
  0x8f   : > { %v550_v2 = vld [vmem:[%s3390_s1 + $0x10] sm:$0xff]  ;;  %v2446_v3 = vpack.c.bf16 %v549_v1, %v548_v0  ;;  %v551_v4 = vld [vmem:[%s3390_s1 + $0x18] sm:$0xff]  ;;  %v2210_v8 = vld [vmem:[%s3391_s2] ss:$0 sm:$0xff]  ;;  %vm658_vm1 = vcmask 64512   ;;  %s2895_s21 = smov 96  }
  0x90   : > { %s542_s5 = scalar_select %p541_p10, %s3010_s13, 1  ;;  %v2450_v6 = vpack.c.bf16 %v551_v4, %v550_v2  ;;  %vm3198_vm2 = vmpackc.low %vm658_vm1, %vm658_vm1  ;;  %vm744_vm3 = vcmask 130048   ;;  %v641_v42 = vld [vmem:[%s3392_s3] sm:$0xff]  ;;  %vm1948_vm4 = vcmask 523264  }
  0x91   : > { %2447 = vmatprep.subr.bf16.mxu0 %v2446_v3  ;;  %s2896_s25 = smov 120   ;;  %s2899_s28 = smov 80  }
  0x92   : > { %s2261_s6 = sshll.u32 %s542_s5, 4  ;;  %2449 = vmatpush3.bf16.msra.mxu0 %v2446_v3  ;;  %s2897_s5 = smov 64  }
  0x93   : > { %s545_s16 = scalar_lea.vmem %s3389_s0, %s2261_s6  ;;  %2451 = vmatprep.subr.bf16.mxu0 %v2450_v6  ;;  %s2898_s6 = smov 88  }
  0x94   : > { %v3174_v5 = vld [vmem:[%s545_s16] sm:$0xff]  ;;  %v3178_v7 = vld [vmem:[%s545_s16 + $0x8] sm:$0xff]  ;;  %s2900_s14 = smov 112   ;;  %s2901_s18 = smov 56  }
  0x95   : > { %2337 = vmatprep.mubr.msk.f32.mxu0 %vm559_vm0, %v3174_v5  ;;  %s2902_s29 = smov 72   ;;  %s2903_s23 = smov 104  }
  0x96   : > { %2453 = vmatpush3.bf16.msra.mxu0 %v2450_v6  ;;  %s2904_s20 = smov 48   ;;  %s2905_s22 = smov 40  }
  0x97   : > { %s3440_s15 = sld [smem:[#allocation23_spill]]  ;;  %p3441_p3 = scmp.ne.s32.totalorder %s3423_s26, 0 }
  0x99   : > { %2338 = vmatmul.mubr.msk.f32.vlgmr.msra.gmra.mrb[0].mxu0 %vm559_vm0, %v3178_v7 }
 0x16c   : > { %v2339_v9 = vpop.f32.mrb[0].mxu0 }
 0x16d   : > { %v3185_v10 = vadd.f32 %v2339_v9, %v2210_v8  ;;  %v632_v11 = vpop.f32.mrb[1].mxu0 }
 0x16e   : > { %v3187_v12 = vadd.f32 %v2210_v8, %v632_v11 }
 0x170   : > { %2344 = vmatprep.mubr.msk.f32.mxu1 %vm658_vm1, %v3187_v12  ;;  %v3193_v13 = vpack.i.bf16 %v3185_v10, %v3187_v12 }
 0x172   : > { %2622 = vrot.lane.b32.xlu0 %v3193_v13, %s2895_s21 }
 0x1e4   : > { %v2623_v14 = vpop.permute.xlu0 %2622 }
 0x1e5   : > { %v2625_v15 = vunpack.i.h.bf16 %v2623_v14  ;;  %v2624_v16 = vunpack.i.l.bf16 %v2623_v14 }
 0x1e7   : > { %v2454_v18 = vpack.c.bf16 %v2625_v15, %v2624_v16 }
 0x1e9   : > { %2456 = vmatprep.subr.msk.bf16.mxu1 %vm3198_vm2, %v2454_v18 }
 0x1ea   : > { %2459 = vmatpush3.bf16.xpose.msk.msra.mxu1 %vm3198_vm2, %v2454_v18 }
 0x1f1   : > { %2345 = vmatmul.mubr.msk.f32.vlgmr.msra.gmra.mrb[0].mxu1 %vm658_vm1, %v3185_v10 }
 0x2c4   : > { %v2346_v19 = vpop.f32.mrb[0].mxu1 }
 0x2c5   : > { %v743_v20 = vmul.f32 0.35355338, %v2346_v19  ;;  %v733_v21 = vpop.f32.mrb[1].mxu1 }
 0x2c6   : > { %v742_v22 = vmul.f32 0.35355338, %v733_v21 }
 0x2c7   : > { %v748_v23 = vsel %vm744_vm3, %v743_v20, -inf }
 0x2c8   : > { %749 = vmax.xlane.f32.xlu1 %v748_v23  ;;  %v745_v24 = vsel %vm744_vm3, %v742_v22, -inf }
 0x2c9   : > { %746 = vmax.xlane.f32.xlu0 %v745_v24 }
 0x2df   : > { %939 = vrot.lane.b32.xlu0 %v3185_v10, %s2896_s25 }
 0x355   : > { %v750_v25 = vpop.xlane.xlu1 %749 }
 0x356   : > { %v752_v26 = vsub.f32 %v743_v20, %v750_v25  ;;  %v747_v27 = vpop.xlane.xlu0 %746 }
 0x357   : > { %v751_v28 = vsub.f32 %v742_v22, %v747_v27 }
 0x358   : > { %v755_v29 = vmul.f32 1.442695, %v752_v26 }
 0x359   : > { %v753_v30 = vmul.f32 1.442695, %v751_v28 }
 0x35a   : > { %2661 = vpow2.f32 %v755_v29  ;;  %v940_v57 = vpop.permute.xlu0 %939 }
 0x35b   : > { %2663 = vpow2.f32 %v753_v30 }
 0x364   : > { %v2662_v31 = vpop.eup %2661 }
 0x365   : > { %v760_v32 = vsel %vm744_vm3, %v2662_v31, 0.0  ;;  %v2664_v33 = vpop.eup %2663 }
 0x366   : > { %761 = vadd.xlane.f32.xlu1 %v760_v32  ;;  %v757_v34 = vsel %vm744_vm3, %v2664_v33, 0.0 }
 0x36a   : > { %758 = vadd.xlane.f32.xlu1 %v757_v34 }
 0x37b   : > { %2627 = vrot.lane.b32.xlu1 %v3193_v13, %s2897_s5  ;;  %s2906_s5 = smov [#allocation10]  }
 0x37f   : > { %2632 = vrot.lane.b32.xlu1 %v3193_v13, %s2898_s6  ;;  %s2817_s6 = sshll.u32 %s2906_s5, 4  ;;  %s2818_s6 = int_to_ptr.vmem [resolvable:$false] %s2817_s6 }
 0x383   : > { %937 = vrot.lane.b32.xlu1 %v3187_v12, %s2896_s25 }
 0x387   : > { %2637 = vrot.lane.b32.xlu1 %v3193_v13, %s2899_s28  ;;  %s2819_s28 = scalar_lea.vmem %s2818_s6, 512 }
 0x38b   : > { %1222 = vrot.lane.b32.xlu1 %v3187_v12, %s2900_s14 }
 0x38f   : > { %1224 = vrot.lane.b32.xlu1 %v3185_v10, %s2900_s14  ;;  %s538_s14 = sand.u32 1, %s2879_s19  }
 0x390   : > { %s3348_s25 = scalar_lea.sflag [#allocation4], %s538_s14 }
 0x3f3   : > { %v762_v35 = vpop.xlane.xlu1 %761 }
 0x3f4   : > { %2665 = vrcp.f32 %v762_v35 }
 0x3f7   : > { %v759_v36 = vpop.xlane.xlu1 %758 }
 0x3f8   : > { %2667 = vrcp.f32 %v759_v36 }
 0x3fb   : > { %v2628_v37 = vpop.permute.xlu1 %2627 }
 0x3fc   : > { %v2630_v38 = vunpack.i.h.bf16 %v2628_v37  ;;  %v2629_v39 = vunpack.i.l.bf16 %v2628_v37 }
 0x3fe   : > { %v2460_v40 = vpack.c.bf16 %v2630_v38, %v2629_v39  ;;  %v2666_v43 = vpop.eup %2665 }
 0x3ff   : > { %v2633_v41 = vpop.permute.xlu1 %2632  ;;  %v766_v48 = vmul.f32 %v2666_v43, %v2662_v31 }
 0x400   : > { %2461 = vmatprep.subr.bf16.mxu0 %v2460_v40  ;;  %v2635_v45 = vunpack.i.h.bf16 %v2633_v41  ;;  %v2634_v46 = vunpack.i.l.bf16 %v2633_v41 }
 0x401   : > { %2463 = vmatpush3.bf16.msra.mxu0 %v2460_v40 }
 0x402   : > { %v2668_v44 = vpop.eup %2667  ;;  %2354 = vmatprep.subr.mxu0 %v641_v42  ;;  %v2464_v49 = vpack.c.bf16 %v2635_v45, %v2634_v46 }
 0x403   : > { %v765_v47 = vmul.f32 %v2668_v44, %v2664_v33  ;;  %v938_v50 = vpop.permute.xlu1 %937 }
 0x405   : > { %2351 = vmatprep.mubr.msk.f32.mxu0 %vm744_vm3, %v765_v47 }
 0x406   : > { %2352 = vmatmul.mubr.msk.f32.vlgmr.msra.gmra.mrb[2].mxu0 %vm744_vm3, %v766_v48 }
 0x407   : > { %2355 = vmatpush3.msra.mxu0 %v641_v42  ;;  %v2638_v51 = vpop.permute.xlu1 %2637 }
 0x408   : > { %2466 = vmatprep.subr.msk.bf16.mxu0 %vm3198_vm2, %v2464_v49  ;;  %v2640_v52 = vunpack.i.h.bf16 %v2638_v51  ;;  %v2639_v53 = vunpack.i.l.bf16 %v2638_v51 }
 0x40a   : > { %v2474_v56 = vpack.c.bf16 %v2640_v52, %v2639_v53 }
 0x40b   : > { %v1223_v58 = vpop.permute.xlu1 %1222 }
 0x40f   : > { %v1225_v59 = vpop.permute.xlu1 %1224 }
 0x4d9   : > { %v2353_v54 = vpop.f32.mrb[2].mxu0 }
 0x4da   : > { %v845_v55 = vpop.f32.mrb[3].mxu0 }
 0x4db   : > { %2356 = vmatprep.mubr.msk.f32.mxu0 %vm658_vm1, %v845_v55 }
 0x4dc   : > { %2357 = vmatmul.mubr.msk.f32.vlgmr.msra.gmra.mrb[4].mxu0 %vm658_vm1, %v2353_v54 }
 0x4dd   : > { %2469 = vmatpush3.bf16.xpose.msk.msra.mxu0 %vm3198_vm2, %v2464_v49  ;;  %2363 = vmatprep.mubr.msk.f32.mxu0 %vm658_vm1, %v938_v50 }
 0x4de   : > { %2476 = vmatprep.subr.msk.bf16.mxu0 %vm3198_vm2, %v2474_v56 }
 0x4e4   : > { %2364 = vmatmul.mubr.msk.f32.vlgmr.msra.gmra.mrb[6].mxu0 %vm658_vm1, %v940_v57 }
 0x4e5   : > { %2479 = vmatpush3.bf16.xpose.msk.msra.mxu0 %vm3198_vm2, %v2474_v56  ;;  %2382 = vmatprep.mubr.msk.f32.mxu0 %vm658_vm1, %v1223_v58 }
 0x4ec   : > { %2383 = vmatmul.mubr.msk.f32.vlgmr.msra.gmra.mrb[8].mxu0 %vm658_vm1, %v1225_v59 }
 0x5af   : > { %v3238_v60 = vpop.f32.mrb[4].mxu0 }
 0x5b0   : > { %v3240_v61 = vpop.f32.mrb[5].mxu0 }
 0x5b7   : > { %v2365_v62 = vpop.f32.mrb[6].mxu0 }
 0x5b8   : > { %v1029_v63 = vmul.f32 0.35355338, %v2365_v62  ;;  %v1019_v0 = vpop.f32.mrb[7].mxu0 }
 0x5b9   : > { %v1028_v1 = vmul.f32 0.35355338, %v1019_v0  ;;  %v643_v0 = vld [vmem:[%s3392_s3 + $0x10] sm:$0xff] }
 0x5ba   : > { %v1033_v2 = vsel %vm744_vm3, %v1029_v63, -inf }
 0x5bb   : > { %1034 = vmax.xlane.f32.xlu0 %v1033_v2  ;;  %v1030_v3 = vsel %vm744_vm3, %v1028_v1, -inf }
 0x5bc   : > { %1031 = vmax.xlane.f32.xlu1 %v1030_v3 }
 0x5bf   : > { %v2384_v4 = vpop.f32.mrb[8].mxu0 }
 0x5c0   : > { %v1304_v6 = vpop.f32.mrb[9].mxu0  ;;  %v1314_v24 = vmul.f32 0.35355338, %v2384_v4 }
 0x5c1   : > { %v1313_v22 = vmul.f32 0.35355338, %v1304_v6 }
 0x5c2   : > { %v1318_v25 = vsel %vm744_vm3, %v1314_v24, -inf }
 0x5c3   : > { %v1315_v23 = vsel %vm744_vm3, %v1313_v22, -inf }
 0x648   : > { %v1035_v8 = vpop.xlane.xlu0 %1034 }
 0x649   : > { %v1037_v9 = vsub.f32 %v1029_v63, %v1035_v8  ;;  %v1032_v11 = vpop.xlane.xlu1 %1031 }
 0x64a   : > { %v1036_v14 = vsub.f32 %v1028_v1, %v1032_v11 }
 0x64b   : > { %v1040_v15 = vmul.f32 1.442695, %v1037_v9 }
 0x64c   : > { %v1038_v16 = vmul.f32 1.442695, %v1036_v14 }
 0x64d   : > { %2669 = vpow2.f32 %v1040_v15 }
 0x64e   : > { %2671 = vpow2.f32 %v1038_v16 }
 0x657   : > { %v2670_v18 = vpop.eup %2669 }
 0x658   : > { %v2672_v19 = vpop.eup %2671  ;;  %v1045_v20 = vsel %vm744_vm3, %v2670_v18, 0.0 }
 0x659   : > { %1046 = vadd.xlane.f32.xlu0 %v1045_v20  ;;  %v1042_v21 = vsel %vm744_vm3, %v2672_v19, 0.0 }
 0x65a   : > { %1043 = vadd.xlane.f32.xlu1 %v1042_v21 }
 0x66b   : > { %2642 = vrot.lane.b32.xlu1 %v3193_v13, %s2901_s18  ;;  %s2207_s18 = sshll.u32 %s538_s14, 4 }
 0x66f   : > { %2647 = vrot.lane.b32.xlu0 %v3193_v13, %s2902_s29  ;;  %1507 = vrot.lane.b32.xlu1 %v3187_v12, %s2903_s23 }
 0x673   : > { %1509 = vrot.lane.b32.xlu1 %v3185_v10, %s2903_s23 }
 0x68e   : > { %1316 = vmax.xlane.f32.xlu0 %v1315_v23 }
 0x697   : > { %1319 = vmax.xlane.f32.xlu1 %v1318_v25 }
 0x6a8   : > { %2652 = vrot.lane.b32.xlu1 %v3193_v13, %s2904_s20  ;;  %s2262_s20 = sshll.u32 %s3010_s13, 8 }
 0x6a9   : > { %s3343_s21 = scalar_lea.hbm %s3440_s15, %s2262_s20 }
 0x6ac   : > { %2657 = vrot.lane.b32.xlu1 %v3193_v13, %s2905_s22  ;;  %v642_v13 = vld [vmem:[%s3392_s3 + $0x8] sm:$0xff]  ;;  %s540_s22 = scalar_lea.vmem [#allocation10], %s2207_s18 }
 0x6ad   : > { %s2092_s30 = sshll.u32 %s540_s22, 4  ;;  %s3345_s30 = int_to_ptr.vmem [resolvable:$true] %s2092_s30 }
 0x6ae   : > { %s2813_s13 = scalar_lea.vmem %s3345_s30, 256  ;;  %p2820_p8 = scmp.lt.s32.totalorder %s3345_s30, %s2818_s6 }
 0x6af   : > { %p2814_p2 = scmp.ne.s32.totalorder %s3345_s30, %s2813_s13  ;;  %p2821_p11 = scmp.lt.s32.totalorder %s2819_s28, %s2813_s13 }
 0x6b1   : > { %p2815_p4 = pnand %p2814_p2, %p3441_p3  ;;  %p2822_p13 = por %p2821_p11, %p2820_p8 }
 0x6b3   : > { %p2816_p7 = pneg %p2815_p4 }
 0x6b5   : > { %p2823_p1 = pnand %p2822_p13, %p2816_p7 }
 0x6e6   : > { %v1047_v26 = vpop.xlane.xlu0 %1046 }
 0x6e7   : > { %2673 = vrcp.f32 %v1047_v26  ;;  %v1044_v27 = vpop.xlane.xlu1 %1043 }
 0x6e8   : > { %2675 = vrcp.f32 %v1044_v27 }
 0x6ea   : > { %v2648_v12 = vpop.permute.xlu0 %2647 }
 0x6eb   : > { %v2650_v10 = vunpack.i.h.bf16 %v2648_v12  ;;  %v2649_v28 = vunpack.i.l.bf16 %v2648_v12  ;;  %v2643_v29 = vpop.permute.xlu1 %2642  ;;  %v644_v12 = vld [vmem:[%s3392_s3 + $0x18] sm:$0xff] }
 0x6ec   : > { %v2645_v30 = vunpack.i.h.bf16 %v2643_v29  ;;  %v2644_v31 = vunpack.i.l.bf16 %v2643_v29 }
 0x6ed   : > { %v2484_v32 = vpack.c.bf16 %v2650_v10, %v2649_v28 }
 0x6ee   : > { %v2470_v33 = vpack.c.bf16 %v2645_v30, %v2644_v31 }
 0x6ef   : > { %2486 = vmatprep.subr.msk.bf16.mxu0 %vm3198_vm2, %v2484_v32  ;;  %v1508_v34 = vpop.permute.xlu1 %1507 }
 0x6f0   : > { %2471 = vmatprep.subr.bf16.mxu1 %v2470_v33  ;;  %2489 = vmatpush3.bf16.xpose.msk.msra.mxu0 %vm3198_vm2, %v2484_v32 }
 0x6f1   : > { %v2674_v35 = vpop.eup %2673  ;;  %2401 = vmatprep.mubr.msk.f32.mxu0 %vm658_vm1, %v1508_v34  ;;  %2473 = vmatpush3.bf16.msra.mxu1 %v2470_v33 }
 0x6f2   : > { %v2676_v36 = vpop.eup %2675  ;;  %2373 = vmatprep.subr.mxu1 %v642_v13  ;;  %v1051_v38 = vmul.f32 %v2674_v35, %v2670_v18 }
 0x6f3   : > { %v1050_v37 = vmul.f32 %v2676_v36, %v2672_v19  ;;  %v1510_v39 = vpop.permute.xlu1 %1509 }
 0x6f5   : > { %2370 = vmatprep.mubr.msk.f32.mxu1 %vm744_vm3, %v1050_v37 }
 0x6f6   : > { %2371 = vmatmul.mubr.msk.f32.vlgmr.msra.gmra.mrb[2].mxu1 %vm744_vm3, %v1051_v38 }
 0x6f7   : > { %2402 = vmatmul.mubr.msk.f32.vlgmr.msra.gmra.mrb[10].mxu0 %vm658_vm1, %v1510_v39  ;;  %2374 = vmatpush3.msra.mxu1 %v642_v13  ;;  %v2213_v13 = vld [vmem:[%s3393_s4] ss:$0 sm:$0xff] }
 0x6f8   : > { %v936_v35 = vadd.f32 %v3238_v60, %v2213_v13  ;;  %v935_v36 = vadd.f32 %v2213_v13, %v3240_v61 }
 0x71b   : > { %v1317_v40 = vpop.xlane.xlu0 %1316 }
 0x71c   : > { %v1321_v41 = vsub.f32 %v1313_v22, %v1317_v40 }
 0x71e   : > { %v1323_v17 = vmul.f32 1.442695, %v1321_v41 }
 0x720   : > { %2677 = vpow2.f32 %v1323_v17 }
 0x724   : > { %v1320_v42 = vpop.xlane.xlu1 %1319 }
 0x725   : > { %v1322_v43 = vsub.f32 %v1314_v24, %v1320_v42 }
 0x727   : > { %v1325_v44 = vmul.f32 1.442695, %v1322_v43 }
 0x728   : > { %v2653_v45 = vpop.permute.xlu1 %2652 }
 0x729   : > { %2679 = vpow2.f32 %v1325_v44  ;;  %v2655_v46 = vunpack.i.h.bf16 %v2653_v45  ;;  %v2654_v47 = vunpack.i.l.bf16 %v2653_v45 }
 0x72a   : > { %v2678_v48 = vpop.eup %2677 }
 0x72b   : > { %v2480_v49 = vpack.c.bf16 %v2655_v46, %v2654_v47  ;;  %v1327_v50 = vsel %vm744_vm3, %v2678_v48, 0.0 }
 0x72c   : > { %1328 = vadd.xlane.f32.xlu0 %v1327_v50  ;;  %v2658_v56 = vpop.permute.xlu1 %2657 }
 0x72d   : > { %2481 = vmatprep.subr.bf16.mxu1 %v2480_v49  ;;  %v2660_v1 = vunpack.i.h.bf16 %v2658_v56  ;;  %v2659_v2 = vunpack.i.l.bf16 %v2658_v56  ;;  %v1933_v56 = vld [vmem:[%s3398_s9] sm:$0xff] }
 0x72f   : > { %v2490_v11 = vpack.c.bf16 %v2660_v1, %v2659_v2  ;;  %v1938_v1 = vld [vmem:[%s3398_s9 + $0x28] sm:$0xff] }
 0x733   : > { %v2680_v51 = vpop.eup %2679 }
 0x734   : > { %v1330_v52 = vsel %vm744_vm3, %v2680_v51, 0.0 }
 0x735   : > { %1331 = vadd.xlane.f32.xlu0 %v1330_v52 }
 0x7b9   : > { %v1329_v53 = vpop.xlane.xlu0 %1328 }
 0x7ba   : > { %2681 = vrcp.f32 %v1329_v53  ;;  %v1841_v53 = vld [vmem:[#allocation7 + $0x10] sm:$0xff] }
 0x7c2   : > { %v1332_v54 = vpop.xlane.xlu0 %1331 }
 0x7c3   : > { %2683 = vrcp.f32 %v1332_v54  ;;  %v1842_v54 = vld [vmem:[#allocation7 + $0x18] sm:$0xff] }
 0x7c4   : > { %v2682_v55 = vpop.eup %2681 }
 0x7c5   : > { %v1335_v63 = vmul.f32 %v2682_v55, %v2678_v48  ;;  %v2498_v55 = vpack.c.bf16 %v1842_v54, %v1841_v53  ;;  %v2254_v53 = vld [vmem:[%s3400_s11] ss:$0 sm:$0xff] }
 0x7c9   : > { %v2372_v57 = vpop.f32.mrb[2].mxu1 }
 0x7ca   : > { %v1130_v58 = vpop.f32.mrb[3].mxu1  ;;  %v2403_v59 = vpop.f32.mrb[10].mxu0 }
 0x7cb   : > { %2375 = vmatprep.mubr.msk.f32.mxu1 %vm658_vm1, %v1130_v58  ;;  %v1589_v62 = vpop.f32.mrb[11].mxu0  ;;  %v1599_v8 = vmul.f32 0.35355338, %v2403_v59  ;;  %v1935_v58 = vld [vmem:[%s3398_s9 + $0x10] sm:$0xff] }
 0x7cc   : > { %v1598_v3 = vmul.f32 0.35355338, %v1589_v62  ;;  %2376 = vmatmul.mubr.msk.f32.vlgmr.msra.gmra.mrb[4].mxu1 %vm658_vm1, %v2372_v57  ;;  %v1934_v57 = vld [vmem:[%s3398_s9 + $0x8] sm:$0xff]  ;;  %v1936_v62 = vld [vmem:[%s3398_s9 + $0x18] sm:$0xff] }
 0x7cd   : > { %v2684_v4 = vpop.eup %2683  ;;  %2483 = vmatpush3.bf16.msra.mxu1 %v2480_v49  ;;  %2389 = vmatprep.mubr.msk.f32.mxu1 %vm744_vm3, %v1335_v63  ;;  %v1603_v14 = vsel %vm744_vm3, %v1599_v8, -inf  ;;  %v2502_v59 = vpack.c.bf16 %v1934_v57, %v1933_v56  ;;  %v2506_v63 = vpack.c.bf16 %v1936_v62, %v1935_v58 }
 0x7ce   : > { %v1336_v6 = vmul.f32 %v2684_v4, %v2680_v51  ;;  %v1600_v9 = vsel %vm744_vm3, %v1598_v3, -inf  ;;  %2392 = vmatprep.subr.mxu1 %v643_v0  ;;  %v1840_v51 = vld [vmem:[#allocation7 + $0x8] sm:$0xff] }
 0x7cf   : > { %1601 = vmax.xlane.f32.xlu0 %v1600_v9 }
 0x7d0   : > { %2390 = vmatmul.mubr.msk.f32.vlgmr.msra.gmra.mrb[6].mxu1 %vm744_vm3, %v1336_v6 }
 0x7d1   : > { %2393 = vmatpush3.msra.mxu1 %v643_v0  ;;  %v1937_v0 = vld [vmem:[%s3398_s9 + $0x20] sm:$0xff] }
 0x7d2   : > { %2491 = vmatprep.subr.bf16.mxu1 %v2490_v11  ;;  %v2510_v2 = vpack.c.bf16 %v1938_v1, %v1937_v0 }
 0x7d3   : > { %1604 = vmax.xlane.f32.xlu0 %v1603_v14 }
 0x85c   : > { %v1602_v15 = vpop.xlane.xlu0 %1601 }
 0x85d   : > { %v1606_v16 = vsub.f32 %v1598_v3, %v1602_v15  ;;  %v2246_v15 = vld [vmem:[#allocation2] ss:$0 sm:$0xff] }
 0x85f   : > { %v1608_v18 = vmul.f32 1.442695, %v1606_v16 }
 0x860   : > { %v1605_v19 = vpop.xlane.xlu0 %1604 }
 0x861   : > { %2685 = vpow2.f32 %v1608_v18  ;;  %v1607_v20 = vsub.f32 %v1599_v8, %v1605_v19  ;;  %v2247_v18 = vld [vmem:[#allocation5] ss:$0 sm:$0xff] }
 0x863   : > { %v1610_v21 = vmul.f32 1.442695, %v1607_v20 }
 0x865   : > { %2687 = vpow2.f32 %v1610_v21 }
 0x86b   : > { %v2686_v22 = vpop.eup %2685 }
 0x86c   : > { %v1612_v23 = vsel %vm744_vm3, %v2686_v22, 0.0 }
 0x86d   : > { %1613 = vadd.xlane.f32.xlu0 %v1612_v23 }
 0x86f   : > { %v2688_v24 = vpop.eup %2687 }
 0x870   : > { %v1615_v25 = vsel %vm744_vm3, %v2688_v24, 0.0 }
 0x871   : > { %1616 = vadd.xlane.f32.xlu0 %v1615_v25  ;;  %v1939_v25 = vld [vmem:[%s3398_s9 + $0x30] sm:$0xff] }
 0x8a3   : > { %v2391_v26 = vpop.f32.mrb[6].mxu1 }
 0x8a4   : > { %v1415_v27 = vpop.f32.mrb[7].mxu1 }
 0x8a5   : > { %2394 = vmatprep.mubr.msk.f32.mxu1 %vm658_vm1, %v1415_v27 }
 0x8a6   : > { %2395 = vmatmul.mubr.msk.f32.vlgmr.msra.gmra.mrb[4].mxu1 %vm658_vm1, %v2391_v26  ;;  %v1940_v26 = vld [vmem:[%s3398_s9 + $0x38] sm:$0xff] }
 0x8a7   : > { %2493 = vmatpush3.bf16.msra.mxu1 %v2490_v11  ;;  %v2514_v27 = vpack.c.bf16 %v1940_v26, %v1939_v25 }
 0x8a8   : > { %2411 = vmatprep.subr.mxu1 %v644_v12 }
 0x8fa   : > { %v1614_v10 = vpop.xlane.xlu0 %1613 }
 0x8fb   : > { %2689 = vrcp.f32 %v1614_v10 }
 0x8fe   : > { %v1617_v28 = vpop.xlane.xlu0 %1616 }
 0x8ff   : > { %2691 = vrcp.f32 %v1617_v28 }
 0x905   : > { %v2690_v29 = vpop.eup %2689 }
 0x906   : > { %v1620_v30 = vmul.f32 %v2690_v29, %v2686_v22 }
 0x908   : > { %2408 = vmatprep.mubr.msk.f32.mxu1 %vm744_vm3, %v1620_v30 }
 0x909   : > { %v2692_v31 = vpop.eup %2691 }
 0x90a   : > { %v1621_v32 = vmul.f32 %v2692_v31, %v2688_v24 }
 0x90c   : > { %2409 = vmatmul.mubr.msk.f32.vlgmr.msra.gmra.mrb[8].mxu1 %vm744_vm3, %v1621_v32 }
 0x90d   : > { %2412 = vmatpush3.msra.mxu1 %v644_v12  ;;  %v2248_v12 = vld [vmem:[#allocation8] ss:$0 sm:$0xff] }
 0x90e   : > { %2503 = vmatprep.subr.bf16.mxu1 %v2502_v59 }
 0x9df   : > { %v2410_v33 = vpop.f32.mrb[8].mxu1 }
 0x9e0   : > { %v1700_v34 = vpop.f32.mrb[9].mxu1 }
 0x9e1   : > { %2413 = vmatprep.mubr.msk.f32.mxu1 %vm658_vm1, %v1700_v34 }
 0x9e2   : > { %2414 = vmatmul.mubr.msk.f32.vlgmr.msra.gmra.mrb[4].mxu1 %vm658_vm1, %v2410_v33  ;;  %v2251_v33 = vld [vmem:[%s3399_s10] ss:$0 sm:$0xff] }
 0x9e3   : > { %2505 = vmatpush3.bf16.msra.mxu1 %v2502_v59 }
 0x9e4   : > { %2507 = vmatprep.subr.bf16.mxu1 %v2506_v63 }
 0x9e7   : > { %2509 = vmatpush3.bf16.msra.mxu1 %v2506_v63 }
 0x9e8   : > { %2511 = vmatprep.subr.bf16.mxu1 %v2510_v2 }
 0x9eb   : > { %2513 = vmatpush3.bf16.msra.mxu1 %v2510_v2 }
 0x9ec   : > { %2515 = vmatprep.subr.bf16.mxu1 %v2514_v27 }
 0x9ef   : > { %2517 = vmatpush3.bf16.msra.mxu1 %v2514_v27 }
 0xab5   : > { %v2415_v37 = vpop.f32.mrb[4].mxu1 }
 0xab6   : > { %v2519_v38 = vadd.f32 %v2415_v37, %v936_v35  ;;  %v1781_v39 = vpop.f32.mrb[5].mxu1 }
 0xab7   : > { %v2521_v40 = vadd.f32 %v1781_v39, %v935_v36 }
 0xab8   : > { %v1793_v41 = vadd.f32 %v2519_v38, %v3178_v7 }
 0xab9   : > { %v1792_v17 = vadd.f32 %v2521_v40, %v3174_v5  ;;  %v1839_v5 = vld [vmem:[#allocation7] sm:$0xff] }
 0xaba   : > { %v1799_v42 = vsel %vm559_vm0, %v1793_v41, 0.0  ;;  %v2494_v52 = vpack.c.bf16 %v1840_v51, %v1839_v5 }
 0xabb   : > { %1800 = vadd.xlane.f32.xlu1 %v1799_v42  ;;  %v1796_v43 = vsel %vm559_vm0, %v1792_v17, 0.0 }
 0xabc   : > { %1797 = vadd.xlane.f32.xlu0 %v1796_v43  ;;  %2495 = vmatprep.subr.bf16.mxu0 %v2494_v52 }
 0xabd   : > { %2497 = vmatpush3.bf16.msra.mxu0 %v2494_v52 }
 0xabe   : > { %2499 = vmatprep.subr.bf16.mxu0 %v2498_v55 }
 0xac1   : > { %2501 = vmatpush3.bf16.msra.mxu0 %v2498_v55  ;;  %v2255_v55 = vld [vmem:[%s3401_s12] ss:$0 sm:$0xff] }
 0xb48   : > { %v1801_v44 = vpop.xlane.xlu1 %1800 }
 0xb49   : > { %v1804_v45 = vmul.f32 0.03125, %v1801_v44  ;;  %v1798_v46 = vpop.xlane.xlu0 %1797 }
 0xb4a   : > { %v1803_v60 = vmul.f32 0.03125, %v1798_v46 }
 0xb4b   : > { %v1806_v47 = vsub.f32 %v1793_v41, %v1804_v45 }
 0xb4c   : > { %v1805_v61 = vsub.f32 %v1792_v17, %v1803_v60 }
 0xb4d   : > { %v1808_v50 = vmul.f32 %v1806_v47, %v1806_v47 }
 0xb4e   : > { %v1807_v48 = vmul.f32 %v1805_v61, %v1805_v61 }
 0xb4f   : > { %v1812_v7 = vsel %vm559_vm0, %v1808_v50, 0.0 }
 0xb50   : > { %v1809_v49 = vsel %vm559_vm0, %v1807_v48, 0.0 }
 0xb51   : > { %1810 = vadd.xlane.f32.xlu0 %v1809_v49 }
 0xb55   : > { %1813 = vadd.xlane.f32.xlu0 %v1812_v7 }
 0xbde   : > { %v1811_v3 = vpop.xlane.xlu0 %1810 }
 0xbdf   : > { %v1815_v4 = vmul.f32 0.03125, %v1811_v3 }
 0xbe1   : > { %v1817_v6 = vadd.f32 1e-05, %v1815_v4 }
 0xbe2   : > { %v1814_v8 = vpop.xlane.xlu0 %1813 }
 0xbe3   : > { %2693 = vrsqrt.f32 %v1817_v6  ;;  %v1816_v9 = vmul.f32 0.03125, %v1814_v8 }
 0xbe5   : > { %v1818_v11 = vadd.f32 1e-05, %v1816_v9 }
 0xbe7   : > { %2695 = vrsqrt.f32 %v1818_v11 }
 0xbed   : > { %v2694_v14 = vpop.eup %2693 }
 0xbee   : > { %v1821_v16 = vmul.f32 %v2694_v14, %v1805_v61 }
 0xbf0   : > { %v1829_v19 = vmul.f32 %v2246_v15, %v1821_v16 }
 0xbf1   : > { %v2696_v20 = vpop.eup %2695 }
 0xbf2   : > { %v1822_v21 = vmul.f32 %v2696_v20, %v1806_v47  ;;  %v1837_v22 = vadd.f32 %v2247_v18, %v1829_v19 }
 0xbf4   : > { %v1830_v23 = vmul.f32 %v2246_v15, %v1822_v21  ;;  %2424 = vmatprep.mubr.msk.f32.mxu0 %vm559_vm0, %v1837_v22 }
 0xbf6   : > { %v1838_v24 = vadd.f32 %v2247_v18, %v1830_v23 }
 0xbf8   : > { %2425 = vmatmul.mubr.msk.f32.vlgmr.msra.gmra.mrb[12].mxu0 %vm559_vm0, %v1838_v24 }
 0xccb   : > { %v2426_v10 = vpop.f32.mrb[12].mxu0 }
 0xccc   : > { %v1928_v28 = vadd.f32 %v2426_v10, %v2248_v12  ;;  %v1922_v29 = vpop.f32.mrb[13].mxu0 }
 0xccd   : > { %v1923_v30 = vadd.f32 %v2248_v12, %v1922_v29 }
 0xcce   : > { %v1932_v32 = vmax.f32 %v1928_v28, 0.0 }
 0xccf   : > { %v1931_v31 = vmax.f32 %v1923_v30, 0.0 }
 0xcd1   : > { %2443 = vmatprep.mubr.msk.f32.mxu1 %vm1948_vm4, %v1931_v31 }
 0xcd2   : > { %2444 = vmatmul.mubr.msk.f32.vlgmr.msra.gmra.mrb[10].mxu1 %vm1948_vm4, %v1932_v32 }
 0xda5   : > { %v2445_v34 = vpop.f32.mrb[10].mxu1 }
 0xda6   : > { %v2021_v13 = vpop.f32.mrb[11].mxu1  ;;  %v2027_v35 = vadd.f32 %v2445_v34, %v2251_v33 }
 0xda7   : > { %v2022_v36 = vadd.f32 %v2251_v33, %v2021_v13 }
 0xda8   : > { %v2031_v39 = vadd.f32 %v2027_v35, %v1838_v24 }
 0xda9   : > { %v2030_v37 = vadd.f32 %v2022_v36, %v1837_v22 }
 0xdaa   : > { %v2037_v40 = vsel %vm559_vm0, %v2031_v39, 0.0 }
 0xdab   : > { %v2034_v38 = vsel %vm559_vm0, %v2030_v37, 0.0 }
 0xdac   : > { %2035 = vadd.xlane.f32.xlu0 %v2034_v38 }
 0xdb0   : > { %2038 = vadd.xlane.f32.xlu0 %v2037_v40 }
 0xe39   : > { %v2036_v41 = vpop.xlane.xlu0 %2035 }
 0xe3a   : > { %v2040_v17 = vmul.f32 0.03125, %v2036_v41 }
 0xe3c   : > { %v2042_v42 = vsub.f32 %v2030_v37, %v2040_v17 }
 0xe3d   : > { %v2039_v43 = vpop.xlane.xlu0 %2038 }
 0xe3e   : > { %v2041_v44 = vmul.f32 0.03125, %v2039_v43  ;;  %v2044_v45 = vmul.f32 %v2042_v42, %v2042_v42 }
 0xe40   : > { %v2043_v46 = vsub.f32 %v2031_v39, %v2041_v44  ;;  %v2046_v60 = vsel %vm559_vm0, %v2044_v45, 0.0 }
 0xe41   : > { %2047 = vadd.xlane.f32.xlu0 %v2046_v60 }
 0xe42   : > { %v2045_v47 = vmul.f32 %v2043_v46, %v2043_v46 }
 0xe44   : > { %v2049_v61 = vsel %vm559_vm0, %v2045_v47, 0.0 }
 0xe45   : > { %2050 = vadd.xlane.f32.xlu0 %v2049_v61 }
 0xece   : > { %v2048_v48 = vpop.xlane.xlu0 %2047 }
 0xecf   : > { %v2052_v49 = vmul.f32 0.03125, %v2048_v48 }
 0xed1   : > { %v2054_v50 = vadd.f32 1e-05, %v2052_v49 }
 0xed2   : > { %v2051_v7 = vpop.xlane.xlu0 %2050 }
 0xed3   : > { %2697 = vrsqrt.f32 %v2054_v50  ;;  %v2053_v5 = vmul.f32 0.03125, %v2051_v7 }
 0xed5   : > { %v2055_v51 = vadd.f32 1e-05, %v2053_v5 }
 0xed7   : > { %2699 = vrsqrt.f32 %v2055_v51 }
 0xedd   : > { %v2698_v52 = vpop.eup %2697 }
 0xede   : > { %v2058_v54 = vmul.f32 %v2698_v52, %v2042_v42 }
 0xee0   : > { %v2066_v56 = vmul.f32 %v2254_v53, %v2058_v54 }
 0xee1   : > { %v2700_v57 = vpop.eup %2699 }
 0xee2   : > { %v2074_v58 = vadd.f32 %v2255_v55, %v2066_v56  ;;  %v2059_v59 = vmul.f32 %v2700_v57, %v2043_v46 }
 0xee4   : > { %v2067_v62 = vmul.f32 %v2254_v53, %v2059_v59  ;;  %2076 = vst.msk [vmem:[%s540_s22] sm:$0xff] %vm559_vm0, %v2074_v58 }
 0xee6   : > { %v2075_v63 = vadd.f32 %v2255_v55, %v2067_v62 }
 0xee8   : > { %2077 = vst.msk [vmem:[%s540_s22 + $0x8] sm:$0xff] %vm559_vm0, %v2075_v63 }
 0xee9   : > { %2826 = shalt.err (!%p2823_p1)
}
 0xeea   : > { %s2827_s14 = scalar_lea.hbm %s3343_s21, 256  ;;  %s2831_s18 = scalar_lea.hbm %s3440_s15, 512 }
 0xeeb   : > { %p2828_p0 = scmp.ne.s32.totalorder %s3343_s21, %s2827_s14  ;;  %p2832_p9 = scmp.lt.u32.totalorder %s3343_s21, %s3440_s15 }
 0xeec   : > { %p2833_p12 = scmp.lt.u32.totalorder %s2831_s18, %s2827_s14  ;;  %p2835_p2 = scmp.lt.u32.totalorder %s2827_s14, %s3343_s21 }
 0xeed   : > { %p2829_p6 = pnand %p2828_p0, %p3441_p3 }
 0xeee   : > { %p2834_p10 = por %p2833_p12, %p2832_p9 }
 0xeef   : > { %p2830_p5 = pneg %p2829_p6 }
 0xef0   : > { %p2836_p4 = por %p2835_p2, %p2834_p10 }
 0xef2   : > { %p2837_p7 = pnand %p2836_p4, %p2830_p5 }
 0xef4   : > { %2840 = shalt.err (!%p2837_p7)
}
 0xef5   : > { %s2907_s20 = smov 128   ;;  %s2908_s22 = smov 8  }
 0xef6   : > { %2542 = dma.vmem_to_hbm [thread:$0]  (%p3441_p3), %s3345_s30, 256, %s3343_s21, %s3348_s25, %s2907_s20, %s2907_s20, %s2908_s22  }
 0xef7 PF: > { %s3442_s17 = sld [smem:[#allocation17_spill]]  ;;  %s3443_s24 = sld [smem:[#allocation15_spill]] }
 0xef8   : > { %s3444_s13 = sld [smem:[#allocation20_spill]] }
 0xefd   : > { %p2569_p8 = scmp.ge.s32.totalorder %s3442_s17, 2  ;;  %s2107_s5 = sand.u32 1, %s3443_s24  }
 0xefe   : > { %p3445_p11 = scmp.ne.s32.totalorder %s3444_s13, 0  ;;  %s2108_s6 = scalar_lea.sflag [#allocation4], %s2107_s5 }
 0xf00   : > { %p2558_p13 = pnand %p2569_p8, %p3445_p11 }
 0xf02   : > { %2870 = dma.done.wait (!%p2558_p13), %s2108_s6, 256  }
 0xf03   : > { %2872 = vsyncadd (!%p2558_p13), %s2108_s6, 4294967040  ;;  %s3446_s21 = sld [smem:[#allocation18_spill]]  ;;  %s3447_s28 = sld [smem:[#allocation16_spill]] }
 0xf04   : > { %s3448_s20 = sld [smem:[#allocation19_spill]]  ;;  %s3449_s18 = smov %s2879_s19 }
 0xf09   : > { %p28_p1 = scmp.ge.s32.totalorder %s3446_s21, 4   ;;  %s3450_s19 = smov %s3447_s28 }
 0xf0b   :  { %30 = sbr.rel (!%p28_p1) target bundleno = 10 (0xa), region = 132 }
 0xf12   :  { %2113 = vsyncpa [#allocation3], 1 }
 0xf13   :  { %2115 = vsyncpa [#allocation3 + $0x1], 1 }
 0xf14   :  { %2116 = vsyncpa [#allocation6], 1 }
 0xf15   :  { %2117 = vsyncpa [#allocation9], 1 }
 0xf16   :  { %2118 = vsyncpa [#allocation4], 1 }
 0xf17   :  { %2120 = vsyncpa [#allocation4 + $0x1], 1 }

</bundles_post_ra>
